<compile_context>
chip_gen: v7x
topology: tpu7x:2x2x1
jax: 0.10.0
libtpu: 0.0.40
codegen_flags: <defaults>
</compile_context>

<pallas_src>
import jax
import jax.numpy as jnp
from jax.experimental import pallas as pl
from jax.experimental.pallas import tpu as pltpu

EPS = 1e-5


def bn_relu6_kernel(x_ref, gamma_ref, beta_ref, o_ref):
    # x_ref: (N, Ct, HW) — channels on sublanes, spatial on lanes.
    x = x_ref[...].astype(jnp.float32)
    n_red = x.shape[0] * x.shape[2]
    inv_n = 1.0 / float(n_red)

    # One-pass moments: var = E[x^2] - mean^2 (clamped at 0 for safety).
    s = jnp.sum(x, axis=2, keepdims=True)           # (N, Ct, 1) lane-reduce (XLU)
    s = jnp.sum(s, axis=0, keepdims=True)           # (1, Ct, 1)
    ss = jnp.sum(x * x, axis=2, keepdims=True)      # (N, Ct, 1)
    ss = jnp.sum(ss, axis=0, keepdims=True)         # (1, Ct, 1)
    mean = s * inv_n
    var = jnp.maximum(ss * inv_n - mean * mean, 0.0)
    inv_std = jax.lax.rsqrt(var + EPS)               # EUP — free slot

    # Fold gamma/beta into per-channel scale/shift (2 VALU ops/elem + clip).
    gamma = gamma_ref[...][None, :, :]               # (1, Ct, 1)
    beta = beta_ref[...][None, :, :]                 # (1, Ct, 1)
    scale = gamma * inv_std
    shift = beta - mean * scale

    y = x * scale + shift
    o_ref[...] = jnp.minimum(jnp.maximum(y, 0.0), 6.0).astype(o_ref.dtype)


def _pick_c_tile(C, N, HW, itemsize=4, vmem_budget=8 * 1024 * 1024):
    """Pick a channel-tile size: prefer 2 grid steps (one per TensorCore on
    megacore parts), then a single block, then smaller power-of-two tiles."""
    hw_padded = max(pl.cdiv(HW, 128) * 128, 128)     # lane padding in VMEM
    candidates = []
    if C % 2 == 0:
        candidates.append(C // 2)
    candidates += [C, 256, 128, 64, 32, 16, 8]
    for c_tile in candidates:
        if c_tile <= 0 or c_tile % 8 != 0 or C % c_tile != 0:
            continue
        block_bytes = N * c_tile * hw_padded * itemsize
        # in + out, each double-buffered by the BlockSpec pipeline.
        if 4 * block_bytes <= vmem_budget:
            return c_tile
    return C  # last resort: single block


def batchnorm_relu6(x_nchw, gamma, beta):
    N, C, H, W = x_nchw.shape
    HW = H * W

    # Free views only — no HBM-round-trip transposes around the kernel.
    x3d = x_nchw.reshape(N, C, HW)
    g2d = gamma.reshape(C, 1).astype(jnp.float32)
    b2d = beta.reshape(C, 1).astype(jnp.float32)

    c_tile = _pick_c_tile(C, N, HW, jnp.dtype(x3d.dtype).itemsize)
    grid = (C // c_tile,)

    out3d = pl.pallas_call(
        bn_relu6_kernel,
        out_shape=jax.ShapeDtypeStruct((N, C, HW), x3d.dtype),
        grid=grid,
        in_specs=[
            pl.BlockSpec((N, c_tile, HW), lambda i: (0, i, 0)),
            pl.BlockSpec((c_tile, 1), lambda i: (i, 0)),
            pl.BlockSpec((c_tile, 1), lambda i: (i, 0)),
        ],
        out_specs=pl.BlockSpec((N, c_tile, HW), lambda i: (0, i, 0)),
        compiler_params=pltpu.CompilerParams(
            dimension_semantics=("parallel",),
        ),
    )(x3d, g2d, b2d)

    return out3d.reshape(N, C, H, W)


def reference(x_nchw, gamma, beta):
    mean = jnp.mean(x_nchw, axis=(0, 2, 3), keepdims=True)
    var = jnp.mean((x_nchw - mean) ** 2, axis=(0, 2, 3), keepdims=True)
    y = (x_nchw - mean) * jax.lax.rsqrt(var + EPS)
    y = y * gamma.reshape(1, -1, 1, 1) + beta.reshape(1, -1, 1, 1)
    return jnp.clip(y, 0.0, 6.0)


if __name__ == "__main__":
    key = jax.random.PRNGKey(0)
    kx, kg, kb = jax.random.split(key, 3)

    # Shapes implied by the module: BatchNorm2d(384) applied to x78 of
    # shape (1, 384, 14, 14).
    N, C, H, W = 1, 384, 14, 14
    x = jax.random.normal(kx, (N, C, H, W), dtype=jnp.float32)
    # PyTorch default affine params are ones/zeros; perturb so the affine
    # path is actually exercised.
    gamma = 1.0 + 0.1 * jax.random.normal(kg, (C,), dtype=jnp.float32)
    beta = 0.1 * jax.random.normal(kb, (C,), dtype=jnp.float32)

    out = batchnorm_relu6(x, gamma, beta)
    out = jax.block_until_ready(out)

    ref = reference(x, gamma, beta)
    assert out.shape == (N, C, H, W)
    assert jnp.allclose(out, ref, atol=1e-4, rtol=1e-4), "mismatch vs reference"

    # TODO(synk): running_mean/running_var momentum update (track_running_stats)
    # is a training side effect and does not affect the returned tensor; not
    # emitted here.

    print("KERNEL_OK")
</pallas_src>

<mosaic_0001>
module attributes {stable_mosaic.version = 11 : i64} {
  func.func @bn_relu6_kernel(%arg0: i32, %arg1: memref<1x192x196xf32, #tpu.memory_space<vmem>>, %arg2: memref<192x1xf32, #tpu.memory_space<vmem>>, %arg3: memref<192x1xf32, #tpu.memory_space<vmem>>, %arg4: memref<1x192x196xf32, #tpu.memory_space<vmem>>) attributes {dimension_semantics = [#tpu.dimension_semantics<parallel>], iteration_bounds = array<i64: 2>, scalar_prefetch = 0 : i64, scratch_operands = 0 : i64, tpu.core_type = #tpu.core_type<tc>, window_params = [{transform_indices = @transform_0, window_bounds = array<i64: 1, 192, 196>}, {transform_indices = @transform_1, window_bounds = array<i64: 192, 1>}, {transform_indices = @transform_2, window_bounds = array<i64: 192, 1>}, {transform_indices = @transform_3, window_bounds = array<i64: 1, 192, 196>}]} {
    %c0 = arith.constant 0 : index
    %c0_0 = arith.constant 0 : index
    %c0_1 = arith.constant 0 : index
    %0 = vector.load %arg1[%c0, %c0_0, %c0_1] : memref<1x192x196xf32, #tpu.memory_space<vmem>>, vector<1x192x196xf32>
    %cst = arith.constant dense<0.000000e+00> : vector<1x192xf32>
    %1 = vector.multi_reduction <add>, %0, %cst [2] : vector<1x192x196xf32> to vector<1x192xf32>
    %2 = vector.shape_cast %1 : vector<1x192xf32> to vector<1x192x1xf32>
    %cst_2 = arith.constant dense<0.000000e+00> : vector<192x1xf32>
    %3 = vector.multi_reduction <add>, %2, %cst_2 [0] : vector<1x192x1xf32> to vector<192x1xf32>
    %4 = vector.shape_cast %3 : vector<192x1xf32> to vector<1x192x1xf32>
    %5 = arith.mulf %0, %0 : vector<1x192x196xf32>
    %cst_3 = arith.constant dense<0.000000e+00> : vector<1x192xf32>
    %6 = vector.multi_reduction <add>, %5, %cst_3 [2] : vector<1x192x196xf32> to vector<1x192xf32>
    %7 = vector.shape_cast %6 : vector<1x192xf32> to vector<1x192x1xf32>
    %cst_4 = arith.constant dense<0.000000e+00> : vector<192x1xf32>
    %8 = vector.multi_reduction <add>, %7, %cst_4 [0] : vector<1x192x1xf32> to vector<192x1xf32>
    %9 = vector.shape_cast %8 : vector<192x1xf32> to vector<1x192x1xf32>
    %cst_5 = arith.constant 0.00510204071 : f32
    %10 = vector.broadcast %cst_5 : f32 to vector<1x192x1xf32>
    %11 = arith.mulf %4, %10 : vector<1x192x1xf32>
    %cst_6 = arith.constant 0.00510204071 : f32
    %12 = vector.broadcast %cst_6 : f32 to vector<1x192x1xf32>
    %13 = arith.mulf %9, %12 : vector<1x192x1xf32>
    %14 = arith.mulf %11, %11 : vector<1x192x1xf32>
    %15 = arith.subf %13, %14 : vector<1x192x1xf32>
    %cst_7 = arith.constant 0.000000e+00 : f32
    %16 = vector.broadcast %cst_7 : f32 to vector<1x192x1xf32>
    %17 = arith.maximumf %15, %16 : vector<1x192x1xf32>
    %cst_8 = arith.constant 9.99999974E-6 : f32
    %18 = vector.broadcast %cst_8 : f32 to vector<1x192x1xf32>
    %19 = arith.addf %17, %18 : vector<1x192x1xf32>
    %20 = math.rsqrt %19 : vector<1x192x1xf32>
    %c0_9 = arith.constant 0 : index
    %c0_10 = arith.constant 0 : index
    %21 = vector.load %arg2[%c0_9, %c0_10] : memref<192x1xf32, #tpu.memory_space<vmem>>, vector<192x1xf32>
    %22 = vector.shape_cast %21 : vector<192x1xf32> to vector<1x192x1xf32>
    %c0_11 = arith.constant 0 : index
    %c0_12 = arith.constant 0 : index
    %23 = vector.load %arg3[%c0_11, %c0_12] : memref<192x1xf32, #tpu.memory_space<vmem>>, vector<192x1xf32>
    %24 = vector.shape_cast %23 : vector<192x1xf32> to vector<1x192x1xf32>
    %25 = arith.mulf %22, %20 : vector<1x192x1xf32>
    %26 = arith.mulf %11, %25 : vector<1x192x1xf32>
    %27 = arith.subf %24, %26 : vector<1x192x1xf32>
    %28 = vector.broadcast %25 : vector<1x192x1xf32> to vector<1x192x196xf32>
    %29 = arith.mulf %0, %28 : vector<1x192x196xf32>
    %30 = vector.broadcast %27 : vector<1x192x1xf32> to vector<1x192x196xf32>
    %31 = arith.addf %29, %30 : vector<1x192x196xf32>
    %cst_13 = arith.constant 0.000000e+00 : f32
    %32 = vector.broadcast %cst_13 : f32 to vector<1x192x196xf32>
    %33 = arith.maximumf %31, %32 : vector<1x192x196xf32>
    %cst_14 = arith.constant 6.000000e+00 : f32
    %34 = vector.broadcast %cst_14 : f32 to vector<1x192x196xf32>
    %35 = arith.minimumf %33, %34 : vector<1x192x196xf32>
    %c0_15 = arith.constant 0 : index
    %c0_16 = arith.constant 0 : index
    %c0_17 = arith.constant 0 : index
    %36 = vector.load %arg4[%c0_15, %c0_16, %c0_17] : memref<1x192x196xf32, #tpu.memory_space<vmem>>, vector<1x192x196xf32>
    tpu.vector_store %arg4[%c0_15, %c0_16, %c0_17], %35 {strides = array<i32>} : memref<1x192x196xf32, #tpu.memory_space<vmem>>, vector<1x192x196xf32>,
    return
  }
  func.func @transform_0(%arg0: i32) -> (i32, i32, i32) {
    %c0_i32 = arith.constant 0 : i32
    %c0_i32_0 = arith.constant 0 : i32
    %c0_i32_1 = arith.constant 0 : i32
    return %c0_i32, %arg0, %c0_i32_0 : i32, i32, i32
  }
  func.func @transform_1(%arg0: i32) -> (i32, i32) {
    %c0_i32 = arith.constant 0 : i32
    %c0_i32_0 = arith.constant 0 : i32
    return %arg0, %c0_i32 : i32, i32
  }
  func.func @transform_2(%arg0: i32) -> (i32, i32) {
    %c0_i32 = arith.constant 0 : i32
    %c0_i32_0 = arith.constant 0 : i32
    return %arg0, %c0_i32 : i32, i32
  }
  func.func @transform_3(%arg0: i32) -> (i32, i32, i32) {
    %c0_i32 = arith.constant 0 : i32
    %c0_i32_0 = arith.constant 0 : i32
    %c0_i32_1 = arith.constant 0 : i32
    return %c0_i32, %arg0, %c0_i32_0 : i32, i32, i32
  }
}

</mosaic_0001>

<bundles_post_ra>
// kernel: tpu_custom_call.1
= control target key start
LH: loop header
LB: loop body
LE: loop exit
PB: predicated region body
PF: predicated region fallthrough
CT: control target
= control target key end

     0   :  { %s1561_s12 = smov 0   ;;  %s2449_s0 = inlined_call_operand.vmem [shape: f32[1,384,196], index: 0, kind: input, shape index: {}]   ;;  %s2450_s1 = inlined_call_operand.vmem [shape: f32[384,1], index: 1, kind: input, shape index: {}]   ;;  %s2451_s2 = inlined_call_operand.vmem [shape: f32[384,1], index: 2, kind: input, shape index: {}]   ;;  %s2452_s3 = inlined_call_operand.vmem [shape: f32[1,384,196], index: 3, kind: output, shape index: {}]  }
   0x1 LB: > { %s1410_s13 = sadd.s32 4294967295, %s1538_s12   ;;  %p1414_p0 = scmp.ge.s32.totalorder %s1538_s12, 1  ;;  %s1538_s12 = sphi %s1561_s12, %s13_s12  }
   0x2   : > { %p161_p1 = scmp.lt.s32.totalorder %s1538_s12, 3 }
   0x4   : > { %p162_p2 = pnand %p1414_p0, %p161_p1 }
   0x5   : > { %s197_s14 = smul.u32 (!%p162_p2), 24, %s1410_s13  ;;  %vm271_vm0 = vcmask (!%p162_p2), 556032  }
   0x6   : > { %165 = sbr.rel (%p162_p2) target bundleno = 471 (0x1d7), region = 32 }
   0x7   : > { %p198_p3 = scmp.lt.s32.totalorder (!%p162_p2), %s197_s14, 47 }
   0xd   : > { %s2454_s14 = smov (!%p198_p3, %s197_s14), 47 }
   0xe   : > { %s1423_s15 = sshll.u32 %s2454_s14, 4  ;;  %s1417_s19 = sshll.u32 %s2454_s14, 3 }
   0xf   : > { %s1577_s18 = scalar_lea.vmem %s2449_s0, %s1423_s15  ;;  %s1983_s22 = scalar_lea.vmem %s2450_s1, %s1417_s19 }
  0x10   : > { %v1580_v0 = vld [vmem:[%s1577_s18 + $0x20] sm:$0xff]  ;;  %v1583_v1 = vld [vmem:[%s1577_s18 + $0x28] sm:$0xff]  ;;  %v1594_v5 = vld [vmem:[%s1577_s18 + $0x30] sm:$0xff]  ;;  %s2146_s25 = scalar_lea.vmem %s2451_s2, %s1417_s19  ;;  %s2284_s28 = scalar_lea.vmem %s2452_s3, %s1423_s15 }
  0x11   : > { %v1586_v2 = vld [vmem:[%s1577_s18] sm:$0xff]  ;;  %v280_v3 = vsel %vm271_vm0, %v1583_v1, 0.0  ;;  %v1591_v4 = vld [vmem:[%s1577_s18 + $0x8] sm:$0xff]  ;;  %v1597_v6 = vld [vmem:[%s1577_s18 + $0x38] sm:$0xff] }
  0x12   : > { %v281_v7 = vadd.f32 %v280_v3, %v1580_v0  ;;  %v272_v8 = vsel %vm271_vm0, %v1591_v4, 0.0  ;;  %v284_v9 = vsel %vm271_vm0, %v1597_v6, 0.0  ;;  %v1605_v10 = vld [vmem:[%s1577_s18 + $0x10] sm:$0xff]  ;;  %v1608_v11 = vld [vmem:[%s1577_s18 + $0x18] sm:$0xff]  ;;  %v1617_v15 = vld [vmem:[%s1577_s18 + $0x48] sm:$0xff] }
  0x13   : > { %v273_v12 = vadd.f32 %v272_v8, %v1586_v2  ;;  %v276_v13 = vsel %vm271_vm0, %v1608_v11, 0.0  ;;  %v1614_v14 = vld [vmem:[%s1577_s18 + $0x58] sm:$0xff]  ;;  %v285_v16 = vadd.f32 %v284_v9, %v1594_v5  ;;  %v1622_v18 = vld [vmem:[%s1577_s18 + $0x50] sm:$0xff]  ;;  %v1627_v20 = vld [vmem:[%s1577_s18 + $0x40] sm:$0xff]  ;;  %v288_v21 = vsel %vm271_vm0, %v1617_v15, 0.0 }
  0x14   : > { %282 = vadd.xlane.f32.xlu1 %v281_v7  ;;  %v277_v17 = vadd.f32 %v276_v13, %v1605_v10  ;;  %v292_v19 = vsel %vm271_vm0, %v1614_v14, 0.0  ;;  %v1632_v22 = vld [vmem:[%s1577_s18 + $0x78] sm:$0xff]  ;;  %v1635_v23 = vld [vmem:[%s1577_s18 + $0x68] sm:$0xff]  ;;  %v289_v25 = vadd.f32 %v288_v21, %v1627_v20  ;;  %v1640_v26 = vld [vmem:[%s1577_s18 + $0x70] sm:$0xff] }
  0x15   : > { %274 = vadd.xlane.f32.xlu0 %v273_v12  ;;  %v293_v24 = vadd.f32 %v292_v19, %v1622_v18  ;;  %v300_v27 = vsel %vm271_vm0, %v1632_v22, 0.0  ;;  %v1645_v28 = vld [vmem:[%s1577_s18 + $0x60] sm:$0xff]  ;;  %v296_v29 = vsel %vm271_vm0, %v1635_v23, 0.0  ;;  %v1650_v30 = vld [vmem:[%s1577_s18 + $0x98] sm:$0xff]  ;;  %v1653_v31 = vld [vmem:[%s1577_s18 + $0x88] sm:$0xff] }
  0x16   : > { %v301_v32 = vadd.f32 %v300_v27, %v1640_v26  ;;  %v297_v33 = vadd.f32 %v296_v29, %v1645_v28  ;;  %v1658_v34 = vld [vmem:[%s1577_s18 + $0x90] sm:$0xff]  ;;  %v308_v35 = vsel %vm271_vm0, %v1650_v30, 0.0  ;;  %v1663_v36 = vld [vmem:[%s1577_s18 + $0x80] sm:$0xff]  ;;  %v304_v37 = vsel %vm271_vm0, %v1653_v31, 0.0  ;;  %v1668_v38 = vld [vmem:[%s1577_s18 + $0xb8] sm:$0xff] }
  0x17   : > { %v1671_v39 = vld [vmem:[%s1577_s18 + $0xa8] sm:$0xff]  ;;  %v309_v40 = vadd.f32 %v308_v35, %v1658_v34  ;;  %v305_v41 = vadd.f32 %v304_v37, %v1663_v36  ;;  %v1676_v42 = vld [vmem:[%s1577_s18 + $0xb0] sm:$0xff]  ;;  %v316_v43 = vsel %vm271_vm0, %v1668_v38, 0.0  ;;  %v1681_v44 = vld [vmem:[%s1577_s18 + $0xa0] sm:$0xff] }
  0x18   : > { %286 = vadd.xlane.f32.xlu1 %v285_v16  ;;  %v312_v45 = vsel %vm271_vm0, %v1671_v39, 0.0  ;;  %v1686_v46 = vld [vmem:[%s1577_s18 + $0xd8] sm:$0xff]  ;;  %v1689_v47 = vld [vmem:[%s1577_s18 + $0xc8] sm:$0xff]  ;;  %v317_v48 = vadd.f32 %v316_v43, %v1676_v42  ;;  %v1694_v50 = vld [vmem:[%s1577_s18 + $0xd0] sm:$0xff] }
  0x19   : > { %278 = vadd.xlane.f32.xlu0 %v277_v17  ;;  %v313_v49 = vadd.f32 %v312_v45, %v1681_v44  ;;  %v324_v51 = vsel %vm271_vm0, %v1686_v46, 0.0  ;;  %v1699_v52 = vld [vmem:[%s1577_s18 + $0xc0] sm:$0xff]  ;;  %v320_v53 = vsel %vm271_vm0, %v1689_v47, 0.0  ;;  %v1704_v54 = vld [vmem:[%s1577_s18 + $0xf8] sm:$0xff]  ;;  %v1707_v55 = vld [vmem:[%s1577_s18 + $0xe8] sm:$0xff] }
  0x1a   : > { %v325_v56 = vadd.f32 %v324_v51, %v1694_v50  ;;  %v321_v57 = vadd.f32 %v320_v53, %v1699_v52  ;;  %v1712_v58 = vld [vmem:[%s1577_s18 + $0xf0] sm:$0xff]  ;;  %v332_v59 = vsel %vm271_vm0, %v1704_v54, 0.0  ;;  %v1717_v60 = vld [vmem:[%s1577_s18 + $0xe0] sm:$0xff]  ;;  %v328_v61 = vsel %vm271_vm0, %v1707_v55, 0.0  ;;  %v1722_v62 = vld [vmem:[%s1577_s18 + $0x118] sm:$0xff] }
  0x1b   : > { %v1725_v63 = vld [vmem:[%s1577_s18 + $0x108] sm:$0xff]  ;;  %v333_v3 = vadd.f32 %v332_v59, %v1712_v58  ;;  %v329_v7 = vadd.f32 %v328_v61, %v1717_v60  ;;  %v1730_v8 = vld [vmem:[%s1577_s18 + $0x110] sm:$0xff]  ;;  %v340_v9 = vsel %vm271_vm0, %v1722_v62, 0.0  ;;  %v1735_v12 = vld [vmem:[%s1577_s18 + $0x100] sm:$0xff]  ;;  %v395_v59 = vmul.f32 %v1608_v11, %v1608_v11 }
  0x1c   : > { %294 = vadd.xlane.f32.xlu1 %v293_v24  ;;  %v336_v13 = vsel %vm271_vm0, %v1725_v63, 0.0  ;;  %v1740_v16 = vld [vmem:[%s1577_s18 + $0x138] sm:$0xff]  ;;  %v1743_v17 = vld [vmem:[%s1577_s18 + $0x128] sm:$0xff]  ;;  %v341_v19 = vadd.f32 %v340_v9, %v1730_v8  ;;  %v1748_v24 = vld [vmem:[%s1577_s18 + $0x130] sm:$0xff]  ;;  %v392_v11 = vmul.f32 %v1586_v2, %v1586_v2  ;;  %v396_v2 = vmul.f32 %v1580_v0, %v1580_v0 }
  0x1d   : > { %290 = vadd.xlane.f32.xlu0 %v289_v25  ;;  %v337_v21 = vadd.f32 %v336_v13, %v1735_v12  ;;  %v348_v25 = vsel %vm271_vm0, %v1740_v16, 0.0  ;;  %v1753_v27 = vld [vmem:[%s1577_s18 + $0x120] sm:$0xff]  ;;  %v344_v29 = vsel %vm271_vm0, %v1743_v17, 0.0  ;;  %v394_v13 = vmul.f32 %v1605_v10, %v1605_v10 }
  0x1e   : > { %v349_v35 = vadd.f32 %v348_v25, %v1748_v24  ;;  %v345_v37 = vadd.f32 %v344_v29, %v1753_v27  ;;  %v1771_v43 = vld [vmem:[%s1577_s18 + $0x140] sm:$0xff]  ;;  %v399_v25 = vmul.f32 %v1597_v6, %v1597_v6  ;;  %v398_v10 = vmul.f32 %v1594_v5, %v1594_v5 }
  0x1f   : > { %v1791_v61 = vld [vmem:[%s1577_s18 + $0x160] sm:$0xff]  ;;  %v403_v6 = vmul.f32 %v1614_v14, %v1614_v14  ;;  %v402_v5 = vmul.f32 %v1622_v18, %v1622_v18  ;;  %v400_v0 = vmul.f32 %v1627_v20, %v1627_v20  ;;  %v407_v14 = vmul.f32 %v1632_v22, %v1632_v22 }
  0x20   : > { %302 = vadd.xlane.f32.xlu1 %v301_v32  ;;  %v1758_v32 = vld [vmem:[%s1577_s18 + $0x158] sm:$0xff]  ;;  %v406_v18 = vmul.f32 %v1640_v26, %v1640_v26  ;;  %v404_v20 = vmul.f32 %v1645_v28, %v1645_v28  ;;  %v411_v22 = vmul.f32 %v1650_v30, %v1650_v30  ;;  %v410_v26 = vmul.f32 %v1658_v34, %v1658_v34 }
  0x21   : > { %298 = vadd.xlane.f32.xlu0 %v297_v33  ;;  %v1761_v33 = vld [vmem:[%s1577_s18 + $0x148] sm:$0xff]  ;;  %v408_v28 = vmul.f32 %v1663_v36, %v1663_v36  ;;  %v415_v30 = vmul.f32 %v1668_v38, %v1668_v38  ;;  %v414_v34 = vmul.f32 %v1676_v42, %v1676_v42  ;;  %v412_v36 = vmul.f32 %v1681_v44, %v1681_v44 }
  0x22   : > { %v352_v45 = vsel %vm271_vm0, %v1761_v33, 0.0  ;;  %v419_v38 = vmul.f32 %v1686_v46, %v1686_v46  ;;  %v418_v42 = vmul.f32 %v1694_v50, %v1694_v50  ;;  %v416_v44 = vmul.f32 %v1699_v52, %v1699_v52 }
  0x23   : > { %v353_v53 = vadd.f32 %v352_v45, %v1771_v43  ;;  %v423_v46 = vmul.f32 %v1704_v54, %v1704_v54  ;;  %v422_v50 = vmul.f32 %v1712_v58, %v1712_v58  ;;  %v420_v52 = vmul.f32 %v1717_v60, %v1717_v60 }
  0x24   : > { %310 = vadd.xlane.f32.xlu1 %v309_v40  ;;  %v1766_v40 = vld [vmem:[%s1577_s18 + $0x150] sm:$0xff]  ;;  %v427_v54 = vmul.f32 %v1722_v62, %v1722_v62  ;;  %v426_v58 = vmul.f32 %v1730_v8, %v1730_v8  ;;  %v424_v60 = vmul.f32 %v1735_v12, %v1735_v12  ;;  %v431_v62 = vmul.f32 %v1740_v16, %v1740_v16 }
  0x25   : > { %306 = vadd.xlane.f32.xlu0 %v305_v41  ;;  %v356_v41 = vsel %vm271_vm0, %v1758_v32, 0.0  ;;  %v430_v8 = vmul.f32 %v1748_v24, %v1748_v24  ;;  %v428_v12 = vmul.f32 %v1753_v27, %v1753_v27  ;;  %v435_v16 = vmul.f32 %v1758_v32, %v1758_v32 }
  0x26   : > { %v357_v51 = vadd.f32 %v356_v41, %v1766_v40  ;;  %v452_v41 = vsel %vm271_vm0, %v399_v25, 0.0  ;;  %v434_v24 = vmul.f32 %v1766_v40, %v1766_v40  ;;  %v432_v27 = vmul.f32 %v1771_v43, %v1771_v43 }
  0x28   : > { %318 = vadd.xlane.f32.xlu1 %v317_v48  ;;  %v1776_v48 = vld [vmem:[%s1577_s18 + $0x178] sm:$0xff] }
  0x29   : > { %314 = vadd.xlane.f32.xlu0 %v313_v49  ;;  %v1779_v49 = vld [vmem:[%s1577_s18 + $0x168] sm:$0xff]  ;;  %v439_v32 = vmul.f32 %v1776_v48, %v1776_v48 }
  0x2b   : > { %v532_v43 = vsel %vm271_vm0, %v439_v32, 0.0 }
  0x2c   : > { %326 = vadd.xlane.f32.xlu1 %v325_v56  ;;  %v1784_v56 = vld [vmem:[%s1577_s18 + $0x170] sm:$0xff] }
  0x2d   : > { %322 = vadd.xlane.f32.xlu0 %v321_v57  ;;  %v364_v57 = vsel %vm271_vm0, %v1776_v48, 0.0  ;;  %v436_v48 = vmul.f32 %v1791_v61, %v1791_v61 }
  0x2e   : > { %v365_v9 = vadd.f32 %v364_v57, %v1784_v56  ;;  %v460_v57 = vsel %vm271_vm0, %v403_v6, 0.0 }
  0x30   : > { %334 = vadd.xlane.f32.xlu1 %v333_v3  ;;  %v360_v3 = vsel %vm271_vm0, %v1779_v49, 0.0 }
  0x31   : > { %330 = vadd.xlane.f32.xlu0 %v329_v7  ;;  %v393_v7 = vmul.f32 %v1591_v4, %v1591_v4  ;;  %v397_v4 = vmul.f32 %v1583_v1, %v1583_v1  ;;  %v401_v1 = vmul.f32 %v1617_v15, %v1617_v15  ;;  %v405_v15 = vmul.f32 %v1635_v23, %v1635_v23 }
  0x32   : > { %v409_v23 = vmul.f32 %v1653_v31, %v1653_v31  ;;  %v413_v31 = vmul.f32 %v1671_v39, %v1671_v39  ;;  %v417_v39 = vmul.f32 %v1689_v47, %v1689_v47  ;;  %v421_v47 = vmul.f32 %v1707_v55, %v1707_v55 }
  0x33   : > { %v440_v29 = vsel %vm271_vm0, %v393_v7, 0.0  ;;  %v448_v45 = vsel %vm271_vm0, %v397_v4, 0.0  ;;  %v425_v55 = vmul.f32 %v1725_v63, %v1725_v63  ;;  %v429_v63 = vmul.f32 %v1743_v17, %v1743_v17 }
  0x34   : > { %342 = vadd.xlane.f32.xlu1 %v341_v19  ;;  %v361_v19 = vadd.f32 %v360_v3, %v1791_v61  ;;  %v461_v3 = vadd.f32 %v460_v57, %v402_v5  ;;  %v472_v25 = vsel %vm271_vm0, %v409_v23, 0.0  ;;  %v488_v6 = vsel %vm271_vm0, %v417_v39, 0.0 }
  0x35   : > { %338 = vadd.xlane.f32.xlu0 %v337_v21  ;;  %v444_v21 = vsel %vm271_vm0, %v395_v59, 0.0  ;;  %v456_v59 = vsel %vm271_vm0, %v401_v1, 0.0  ;;  %v473_v4 = vadd.f32 %v472_v25, %v408_v28  ;;  %v489_v1 = vadd.f32 %v488_v6, %v416_v44 }
  0x36   : > { %v457_v7 = vadd.f32 %v456_v59, %v400_v0  ;;  %v496_v5 = vsel %vm271_vm0, %v421_v47, 0.0  ;;  %v508_v0 = vsel %vm271_vm0, %v427_v54, 0.0  ;;  %v433_v17 = vmul.f32 %v1761_v33, %v1761_v33 }
  0x37   : > { %v497_v57 = vadd.f32 %v496_v5, %v420_v52  ;;  %v509_v59 = vadd.f32 %v508_v0, %v426_v58  ;;  %v437_v33 = vmul.f32 %v1779_v49, %v1779_v49  ;;  %v438_v23 = vmul.f32 %v1784_v56, %v1784_v56 }
  0x38   : > { %350 = vadd.xlane.f32.xlu1 %v349_v35  ;;  %v445_v35 = vadd.f32 %v444_v21, %v394_v13  ;;  %v464_v13 = vsel %vm271_vm0, %v405_v15, 0.0 }
  0x39   : > { %346 = vadd.xlane.f32.xlu0 %v345_v37  ;;  %v441_v37 = vadd.f32 %v440_v29, %v392_v11  ;;  %v465_v21 = vadd.f32 %v464_v13, %v404_v20  ;;  %v476_v11 = vsel %vm271_vm0, %v411_v22, 0.0  ;;  %v524_v20 = vsel %vm271_vm0, %v435_v16, 0.0 }
  0x3a   : > { %v477_v29 = vadd.f32 %v476_v11, %v410_v26  ;;  %v520_v22 = vsel %vm271_vm0, %v433_v17, 0.0  ;;  %v1540_v13 = vmov 0   ;;  %v525_v40 = vadd.f32 %v524_v20, %v434_v24 }
  0x3b   : > { %1435 = vset.pattern.permute.xlu1 %v1540_v13  ;;  %1434 = vset.pattern.permute.xlu0 %v1540_v13  ;;  %v528_v26 = vsel %vm271_vm0, %v437_v33, 0.0 }
  0x3c   : > { %358 = vadd.xlane.f32.xlu1 %v357_v51  ;;  %v453_v51 = vadd.f32 %v452_v41, %v398_v10  ;;  %v480_v10 = vsel %vm271_vm0, %v413_v31, 0.0  ;;  %v529_v49 = vadd.f32 %v528_v26, %v436_v48 }
  0x3d   : > { %354 = vadd.xlane.f32.xlu0 %v353_v53  ;;  %v449_v53 = vadd.f32 %v448_v45, %v396_v2  ;;  %v481_v41 = vadd.f32 %v480_v10, %v412_v36  ;;  %v492_v2 = vsel %vm271_vm0, %v419_v38, 0.0 }
  0x3e   : > { %v493_v45 = vadd.f32 %v492_v2, %v418_v42 }
  0x40   : > { %366 = vadd.xlane.f32.xlu1 %v365_v9  ;;  %v468_v9 = vsel %vm271_vm0, %v407_v14, 0.0  ;;  %v504_v14 = vsel %vm271_vm0, %v425_v55, 0.0 }
  0x41   : > { %362 = vadd.xlane.f32.xlu0 %v361_v19  ;;  %v469_v19 = vadd.f32 %v468_v9, %v406_v18  ;;  %v505_v15 = vadd.f32 %v504_v14, %v424_v60  ;;  %v512_v18 = vsel %vm271_vm0, %v429_v63, 0.0 }
  0x42   : > { %v513_v9 = vadd.f32 %v512_v18, %v428_v12 }
  0x44   : > { %446 = vadd.xlane.f32.xlu1 %v445_v35  ;;  %v484_v35 = vsel %vm271_vm0, %v415_v30, 0.0 }
  0x45   : > { %442 = vadd.xlane.f32.xlu0 %v441_v37  ;;  %v485_v37 = vadd.f32 %v484_v35, %v414_v34 }
  0x48   : > { %454 = vadd.xlane.f32.xlu1 %v453_v51  ;;  %v500_v51 = vsel %vm271_vm0, %v423_v46, 0.0 }
  0x49   : > { %450 = vadd.xlane.f32.xlu0 %v449_v53  ;;  %v501_v53 = vadd.f32 %v500_v51, %v422_v50 }
  0x4c   : > { %462 = vadd.xlane.f32.xlu1 %v461_v3  ;;  %v516_v3 = vsel %vm271_vm0, %v431_v62, 0.0 }
  0x4d   : > { %458 = vadd.xlane.f32.xlu0 %v457_v7  ;;  %v517_v7 = vadd.f32 %v516_v3, %v430_v8 }
  0x50   : > { %470 = vadd.xlane.f32.xlu1 %v469_v19  ;;  %v521_v19 = vadd.f32 %v520_v22, %v432_v27 }
  0x51   : > { %466 = vadd.xlane.f32.xlu0 %v465_v21  ;;  %v533_v21 = vadd.f32 %v532_v43, %v438_v23 }
  0x54   : > { %478 = vadd.xlane.f32.xlu1 %v477_v29 }
  0x55   : > { %474 = vadd.xlane.f32.xlu0 %v473_v4 }
  0x58   : > { %486 = vadd.xlane.f32.xlu1 %v485_v37 }
  0x59   : > { %482 = vadd.xlane.f32.xlu0 %v481_v41 }
  0x5c   : > { %494 = vadd.xlane.f32.xlu1 %v493_v45 }
  0x5d   : > { %490 = vadd.xlane.f32.xlu0 %v489_v1 }
  0x60   : > { %502 = vadd.xlane.f32.xlu1 %v501_v53 }
  0x61   : > { %498 = vadd.xlane.f32.xlu0 %v497_v57 }
  0x64   : > { %510 = vadd.xlane.f32.xlu1 %v509_v59 }
  0x65   : > { %506 = vadd.xlane.f32.xlu0 %v505_v15 }
  0x68   : > { %518 = vadd.xlane.f32.xlu1 %v517_v7 }
  0x69   : > { %514 = vadd.xlane.f32.xlu0 %v513_v9 }
  0x6c   : > { %526 = vadd.xlane.f32.xlu1 %v525_v40 }
  0x6d   : > { %522 = vadd.xlane.f32.xlu0 %v521_v19 }
  0x70   : > { %534 = vadd.xlane.f32.xlu1 %v533_v21 }
  0x71   : > { %530 = vadd.xlane.f32.xlu0 %v529_v49 }
  0xa1   : > { %v283_v11 = vpop.xlane.xlu1 %282 }
  0xa2   : > { %v275_v28 = vpop.xlane.xlu0 %274  ;;  %v1953_v53 = vmul.f32 0.0051020407, %v283_v11 }
  0xa3   : > { %v1947_v1 = vmul.f32 0.0051020407, %v275_v28 }
  0xa4   : > { %v610_v12 = vmul.f32 %v1953_v53, %v1953_v53 }
  0xa5   : > { %v287_v30 = vpop.xlane.xlu1 %286  ;;  %v608_v58 = vmul.f32 %v1947_v1, %v1947_v1 }
  0xa6   : > { %v279_v25 = vpop.xlane.xlu0 %278  ;;  %v1949_v52 = vmul.f32 0.0051020407, %v287_v30 }
  0xa7   : > { %v1943_v45 = vmul.f32 0.0051020407, %v279_v25 }
  0xa8   : > { %v611_v63 = vmul.f32 %v1949_v52, %v1949_v52 }
  0xa9   : > { %v295_v56 = vpop.xlane.xlu1 %294  ;;  %v609_v54 = vmul.f32 %v1943_v45, %v1943_v45 }
  0xaa   : > { %v291_v31 = vpop.xlane.xlu0 %290  ;;  %v1957_v60 = vmul.f32 0.0051020407, %v295_v56 }
  0xab   : > { %v1961_v59 = vmul.f32 0.0051020407, %v291_v31 }
  0xac   : > { %v613_v24 = vmul.f32 %v1957_v60, %v1957_v60 }
  0xad   : > { %v303_v29 = vpop.xlane.xlu1 %302  ;;  %v612_v32 = vmul.f32 %v1961_v59, %v1961_v59 }
  0xae   : > { %v299_v34 = vpop.xlane.xlu0 %298  ;;  %v1972_v11 = vmul.f32 0.0051020407, %v303_v29 }
  0xaf   : > { %v1969_v40 = vmul.f32 0.0051020407, %v299_v34 }
  0xb1   : > { %v311_v4 = vpop.xlane.xlu1 %310  ;;  %v614_v25 = vmul.f32 %v1969_v40, %v1969_v40 }
  0xb2   : > { %v1915_v35 = vpop.xlane.xlu0 %306  ;;  %v1974_v28 = vmul.f32 0.0051020407, %v311_v4 }
  0xb5   : > { %v1917_v61 = vpop.xlane.xlu1 %318 }
  0xb6   : > { %v1919_v36 = vpop.xlane.xlu0 %314 }
  0xb9   : > { %v1921_v38 = vpop.xlane.xlu1 %326 }
  0xba   : > { %v1923_v10 = vpop.xlane.xlu0 %322 }
  0xbd   : > { %v1925_v39 = vpop.xlane.xlu1 %334 }
  0xbe   : > { %v1927_v37 = vpop.xlane.xlu0 %330 }
  0xc1   : > { %v1929_v42 = vpop.xlane.xlu1 %342 }
  0xc2   : > { %v1931_v41 = vpop.xlane.xlu0 %338 }
  0xc5   : > { %v1933_v2 = vpop.xlane.xlu1 %350 }
  0xc6   : > { %v1935_v44 = vpop.xlane.xlu0 %346 }
  0xc9   : > { %v1937_v46 = vpop.xlane.xlu1 %358 }
  0xca   : > { %v1939_v6 = vpop.xlane.xlu0 %354 }
  0xcd   : > { %v1941_v47 = vpop.xlane.xlu1 %366 }
  0xce   : > { %v1945_v50 = vpop.xlane.xlu0 %362 }
  0xd1   : > { %v447_v51 = vpop.xlane.xlu1 %446 }
  0xd2   : > { %v585_v5 = vmul.f32 0.0051020407, %v447_v51  ;;  %v443_v55 = vpop.xlane.xlu0 %442 }
  0xd3   : > { %v584_v57 = vmul.f32 0.0051020407, %v443_v55  ;;  %v617_v55 = vmul.f32 %v1974_v28, %v1974_v28 }
  0xd4   : > { %v633_v0 = vsub.f32 %v585_v5, %v609_v54  ;;  %v615_v5 = vmul.f32 %v1972_v11, %v1972_v11 }
  0xd5   : > { %v632_v62 = vsub.f32 %v584_v57, %v608_v58  ;;  %v455_v14 = vpop.xlane.xlu1 %454  ;;  %v1990_v58 = vmul.f32 0.0051020407, %v1917_v61 }
  0xd6   : > { %v657_v8 = vmax.f32 %v633_v0, 0.0  ;;  %v587_v15 = vmul.f32 0.0051020407, %v455_v14  ;;  %v451_v3 = vpop.xlane.xlu0 %450  ;;  %v1994_v14 = vmul.f32 0.0051020407, %v1915_v35 }
  0xd7   : > { %v656_v16 = vmax.f32 %v632_v62, 0.0  ;;  %v586_v18 = vmul.f32 0.0051020407, %v451_v3  ;;  %v729_v62 = vld [vmem:[%s1983_s22 + $0x8] sm:$0xff]  ;;  %v619_v35 = vmul.f32 %v1990_v58, %v1990_v58 }
  0xd8   : > { %v681_v17 = vadd.f32 1e-05, %v657_v8  ;;  %v635_v7 = vsub.f32 %v587_v15, %v611_v63  ;;  %v728_v63 = vld [vmem:[%s1983_s22] sm:$0xff]  ;;  %v1998_v15 = vmul.f32 0.0051020407, %v1921_v38  ;;  %v616_v38 = vmul.f32 %v1994_v14, %v1994_v14 }
  0xd9   : > { %v680_v9 = vadd.f32 1e-05, %v656_v16  ;;  %v634_v20 = vsub.f32 %v586_v18, %v610_v12  ;;  %v463_v27 = vpop.xlane.xlu1 %462 }
  0xda   : > { %1436 = vrsqrt.f32 %v681_v17  ;;  %v659_v22 = vmax.f32 %v635_v7, 0.0  ;;  %v589_v33 = vmul.f32 0.0051020407, %v463_v27  ;;  %v459_v13 = vpop.xlane.xlu0 %458 }
  0xdb   : > { %1438 = vrsqrt.f32 %v680_v9  ;;  %v658_v23 = vmax.f32 %v634_v20, 0.0  ;;  %v588_v19 = vmul.f32 0.0051020407, %v459_v13  ;;  %v730_v13 = vld [vmem:[%s1983_s22 + $0x10] sm:$0xff] }
  0xdc   : > { %v637_v43 = vsub.f32 %v589_v33, %v613_v24  ;;  %v683_v48 = vadd.f32 1e-05, %v659_v22  ;;  %v2009_v22 = vmul.f32 0.0051020407, %v1919_v36  ;;  %v2012_v33 = vmul.f32 0.0051020407, %v1925_v39 }
  0xdd   : > { %v682_v26 = vadd.f32 1e-05, %v658_v23  ;;  %v636_v21 = vsub.f32 %v588_v19, %v612_v32  ;;  %v471_v49 = vpop.xlane.xlu1 %470  ;;  %v621_v23 = vmul.f32 %v1998_v15, %v1998_v15 }
  0xde   : > { %v467_v30 = vpop.xlane.xlu0 %466  ;;  %v661_v34 = vmax.f32 %v637_v43, 0.0  ;;  %v591_v29 = vmul.f32 0.0051020407, %v471_v49 }
  0xdf   : > { %1440 = vrsqrt.f32 %v682_v26  ;;  %v660_v56 = vmax.f32 %v636_v21, 0.0  ;;  %v590_v31 = vmul.f32 0.0051020407, %v467_v30 }
  0xe0   : > { %1442 = vrsqrt.f32 %v683_v48  ;;  %v685_v3 = vadd.f32 1e-05, %v661_v34  ;;  %v639_v12 = vsub.f32 %v591_v29, %v615_v5  ;;  %v618_v29 = vmul.f32 %v2009_v22, %v2009_v22  ;;  %v731_v5 = vld [vmem:[%s1983_s22 + $0x18] sm:$0xff] }
  0xe1   : > { %v684_v4 = vadd.f32 1e-05, %v660_v56  ;;  %v638_v51 = vsub.f32 %v590_v31, %v614_v25  ;;  %v479_v54 = vpop.xlane.xlu1 %478 }
  0xe2   : > { %v593_v57 = vmul.f32 0.0051020407, %v479_v54  ;;  %v475_v0 = vpop.xlane.xlu0 %474  ;;  %v663_v19 = vmax.f32 %v639_v12, 0.0  ;;  %v2029_v54 = vmul.f32 0.0051020407, %v1927_v37 }
  0xe3   : > { %1444 = vrsqrt.f32 %v684_v4  ;;  %v662_v17 = vmax.f32 %v638_v51, 0.0  ;;  %v592_v61 = vmul.f32 0.0051020407, %v475_v0  ;;  %v2024_v4 = vmul.f32 0.0051020407, %v1923_v10 }
  0xe4   : > { %v1437_v8 = vpop.eup %1436  ;;  %v641_v16 = vsub.f32 %v593_v57, %v617_v55  ;;  %1446 = vrsqrt.f32 %v685_v3  ;;  %v623_v51 = vmul.f32 %v2012_v33, %v2012_v33  ;;  %v2033_v55 = vmul.f32 0.0051020407, %v1929_v42 }
  0xe5   : > { %v1439_v18 = vpop.eup %1438  ;;  %v487_v7 = vpop.xlane.xlu1 %486  ;;  %v2000_v24 = vmul.f32 %v1437_v8, %v729_v62  ;;  %v686_v21 = vadd.f32 1e-05, %v662_v17  ;;  %v640_v36 = vsub.f32 %v592_v61, %v616_v38  ;;  %v687_v57 = vadd.f32 1e-05, %v663_v19 }
  0xe6   : > { %v665_v9 = vmax.f32 %v641_v16, 0.0  ;;  %v595_v20 = vmul.f32 0.0051020407, %v487_v7  ;;  %v483_v27 = vpop.xlane.xlu0 %482  ;;  %v2004_v32 = vmul.f32 %v1439_v18, %v728_v63  ;;  %v620_v42 = vmul.f32 %v2024_v4, %v2024_v4 }
  0xe7   : > { %855 = vperm.xlu1 %1435, %v2000_v24   ;;  %v594_v49 = vmul.f32 0.0051020407, %v483_v27  ;;  %v664_v63 = vmax.f32 %v640_v36, 0.0  ;;  %v622_v61 = vmul.f32 %v2029_v54, %v2029_v54  ;;  %v2043_v7 = vmul.f32 0.0051020407, %v1931_v41  ;;  %v737_v36 = vld [vmem:[%s1983_s22 + $0x48] sm:$0xff] }
  0xe8   : > { %v689_v43 = vadd.f32 1e-05, %v665_v9  ;;  %v643_v48 = vsub.f32 %v595_v20, %v619_v35  ;;  %850 = vperm.xlu0 %1434, %v2004_v32   ;;  %v2046_v35 = vmul.f32 0.0051020407, %v1933_v2  ;;  %v732_v9 = vld [vmem:[%s1983_s22 + $0x20] sm:$0xff]  ;;  %v625_v20 = vmul.f32 %v2033_v55, %v2033_v55 }
  0xe9   : > { %v1441_v26 = vpop.eup %1440  ;;  %v495_v30 = vpop.xlane.xlu1 %494  ;;  %v642_v10 = vsub.f32 %v594_v49, %v618_v29 }
  0xea   : > { %1448 = vrsqrt.f32 %v689_v43  ;;  %v667_v39 = vmax.f32 %v643_v48, 0.0  ;;  %v597_v25 = vmul.f32 0.0051020407, %v495_v30  ;;  %v491_v56 = vpop.xlane.xlu0 %490  ;;  %v2019_v31 = vmul.f32 %v1441_v26, %v730_v13  ;;  %v1443_v34 = vpop.eup %1442 }
  0xeb   : > { %1450 = vrsqrt.f32 %v686_v21  ;;  %v596_v8 = vmul.f32 0.0051020407, %v491_v56  ;;  %v2036_v18 = vmul.f32 %v1443_v34, %v731_v5  ;;  %v666_v19 = vmax.f32 %v642_v10, 0.0  ;;  %v733_v56 = vld [vmem:[%s1983_s22 + $0x28] sm:$0xff] }
  0xec   : > { %v691_v0 = vadd.f32 1e-05, %v667_v39  ;;  %v645_v62 = vsub.f32 %v597_v25, %v621_v23  ;;  %860 = vperm.xlu1 %1435, %v2019_v31   ;;  %v688_v23 = vadd.f32 1e-05, %v664_v63  ;;  %v624_v30 = vmul.f32 %v2043_v7, %v2043_v7 }
  0xed   : > { %v503_v3 = vpop.xlane.xlu1 %502  ;;  %v1445_v17 = vpop.eup %1444  ;;  %v644_v43 = vsub.f32 %v596_v8, %v620_v42  ;;  %v627_v39 = vmul.f32 %v2046_v35, %v2046_v35  ;;  %v2060_v25 = vmul.f32 0.0051020407, %v1937_v46 }
  0xee   : > { %1452 = vrsqrt.f32 %v691_v0  ;;  %v669_v12 = vmax.f32 %v645_v62, 0.0  ;;  %v599_v16 = vmul.f32 0.0051020407, %v503_v3  ;;  %v499_v37 = vpop.xlane.xlu0 %498  ;;  %v2052_v21 = vmul.f32 %v1445_v17, %v732_v9  ;;  %v1447_v49 = vpop.eup %1446  ;;  %v734_v9 = vld [vmem:[%s1983_s22 + $0x30] sm:$0xff] }
  0xef   : > { %v598_v13 = vmul.f32 0.0051020407, %v499_v37  ;;  %1454 = vrsqrt.f32 %v687_v57  ;;  %v690_v0 = vadd.f32 1e-05, %v666_v19  ;;  %v668_v62 = vmax.f32 %v644_v43, 0.0 }
  0xf0   : > { %v693_v27 = vadd.f32 1e-05, %v669_v12  ;;  %v647_v38 = vsub.f32 %v599_v16, %v623_v51  ;;  %865 = vperm.xlu1 %1435, %v2036_v18   ;;  %v2066_v12 = vmul.f32 %v1447_v49, %v733_v56  ;;  %v739_v16 = vld [vmem:[%s1983_s22 + $0x58] sm:$0xff]  ;;  %v2070_v17 = vmul.f32 0.0051020407, %v1935_v44 }
  0xf1   : > { %v511_v41 = vpop.xlane.xlu1 %510  ;;  %v646_v51 = vsub.f32 %v598_v13, %v622_v61  ;;  %v629_v42 = vmul.f32 %v2060_v25, %v2060_v25  ;;  %v2075_v61 = vmul.f32 0.0051020407, %v1941_v47  ;;  %v692_v44 = vadd.f32 1e-05, %v668_v62 }
  0xf2   : > { %1456 = vrsqrt.f32 %v693_v27  ;;  %v671_v48 = vmax.f32 %v647_v38, 0.0  ;;  %v601_v2 = vmul.f32 0.0051020407, %v511_v41  ;;  %v507_v26 = vpop.xlane.xlu0 %506 }
  0xf3   : > { %v600_v57 = vmul.f32 0.0051020407, %v507_v26  ;;  %1458 = vrsqrt.f32 %v688_v23  ;;  %v670_v27 = vmax.f32 %v646_v51, 0.0  ;;  %v631_v56 = vmul.f32 %v2075_v61, %v2075_v61 }
  0xf4   : > { %v1449_v34 = vpop.eup %1448  ;;  %v695_v29 = vadd.f32 1e-05, %v671_v48  ;;  %v649_v5 = vsub.f32 %v601_v2, %v625_v20  ;;  %870 = vperm.xlu1 %1435, %v2052_v21  }
  0xf5   : > { %v519_v63 = vpop.xlane.xlu1 %518  ;;  %v2064_v10 = vmul.f32 %v1449_v34, %v737_v36  ;;  %v1451_v37 = vpop.eup %1450  ;;  %v648_v13 = vsub.f32 %v600_v57, %v624_v30  ;;  %v741_v36 = vld [vmem:[%s1983_s22 + $0x68] sm:$0xff]  ;;  %v626_v30 = vmul.f32 %v2070_v17, %v2070_v17  ;;  %v735_v34 = vld [vmem:[%s1983_s22 + $0x38] sm:$0xff]  ;;  %v694_v51 = vadd.f32 1e-05, %v670_v27 }
  0xf6   : > { %1460 = vrsqrt.f32 %v695_v29  ;;  %v673_v8 = vmax.f32 %v649_v5, 0.0  ;;  %v603_v46 = vmul.f32 0.0051020407, %v519_v63  ;;  %v515_v3 = vpop.xlane.xlu0 %514  ;;  %v2082_v26 = vmul.f32 %v1451_v37, %v734_v9  ;;  %v743_v9 = vld [vmem:[%s1983_s22 + $0x78] sm:$0xff] }
  0xf7   : > { %895 = vperm.xlu0 %1434, %v2064_v10   ;;  %1462 = vrsqrt.f32 %v690_v0  ;;  %v602_v19 = vmul.f32 0.0051020407, %v515_v3  ;;  %v672_v5 = vmax.f32 %v648_v13, 0.0  ;;  %v2103_v27 = vmul.f32 0.0051020407, %v1945_v50 }
  0xf8   : > { %v1453_v20 = vpop.eup %1452  ;;  %v697_v38 = vadd.f32 1e-05, %v673_v8  ;;  %v651_v23 = vsub.f32 %v603_v46, %v627_v39  ;;  %875 = vperm.xlu1 %1435, %v2066_v12   ;;  %v2088_v39 = vmul.f32 0.0051020407, %v1939_v6 }
  0xf9   : > { %v527_v43 = vpop.xlane.xlu1 %526  ;;  %v2080_v41 = vmul.f32 %v1453_v20, %v739_v16  ;;  %v1455_v49 = vpop.eup %1454  ;;  %v650_v62 = vsub.f32 %v602_v19, %v626_v30 }
  0xfa   : > { %1464 = vrsqrt.f32 %v697_v38  ;;  %v675_v47 = vmax.f32 %v651_v23, 0.0  ;;  %v605_v48 = vmul.f32 0.0051020407, %v527_v43  ;;  %v523_v2 = vpop.xlane.xlu0 %522  ;;  %v2097_v37 = vmul.f32 %v1455_v49, %v735_v34  ;;  %v736_v38 = vld [vmem:[%s1983_s22 + $0x40] sm:$0xff]  ;;  %v745_v49 = vld [vmem:[%s1983_s22 + $0x88] sm:$0xff] }
  0xfb   : > { %905 = vperm.xlu0 %1434, %v2080_v41   ;;  %1466 = vrsqrt.f32 %v692_v44  ;;  %v604_v63 = vmul.f32 0.0051020407, %v523_v2  ;;  %v696_v23 = vadd.f32 1e-05, %v672_v5  ;;  %v674_v43 = vmax.f32 %v650_v62, 0.0 }
  0xfc   : > { %v1457_v29 = vpop.eup %1456  ;;  %v699_v57 = vadd.f32 1e-05, %v675_v47  ;;  %v653_v0 = vsub.f32 %v605_v48, %v629_v42  ;;  %880 = vperm.xlu1 %1435, %v2082_v26   ;;  %v628_v42 = vmul.f32 %v2088_v39, %v2088_v39  ;;  %v630_v34 = vmul.f32 %v2103_v27, %v2103_v27 }
  0xfd   : > { %v535_v6 = vpop.xlane.xlu1 %534  ;;  %v2095_v8 = vmul.f32 %v1457_v29, %v741_v36  ;;  %v1459_v20 = vpop.eup %1458  ;;  %v698_v5 = vadd.f32 1e-05, %v674_v43 }
  0xfe   : > { %1468 = vrsqrt.f32 %v699_v57  ;;  %v677_v46 = vmax.f32 %v653_v0, 0.0  ;;  %v607_v3 = vmul.f32 0.0051020407, %v535_v6  ;;  %v531_v16 = vpop.xlane.xlu0 %530  ;;  %v652_v47 = vsub.f32 %v604_v63, %v628_v42  ;;  %v747_v6 = vld [vmem:[%s1983_s22 + $0x98] sm:$0xff] }
  0xff   : > { %915 = vperm.xlu0 %1434, %v2095_v8   ;;  %1470 = vrsqrt.f32 %v694_v51  ;;  %v606_v48 = vmul.f32 0.0051020407, %v531_v16  ;;  %v2110_v36 = vmul.f32 %v1459_v20, %v736_v38 }
 0x100   : > { %v1461_v13 = vpop.eup %1460  ;;  %v701_v44 = vadd.f32 1e-05, %v677_v46  ;;  %v655_v19 = vsub.f32 %v607_v3, %v631_v56  ;;  %885 = vperm.xlu1 %1435, %v2097_v37   ;;  %v738_v56 = vld [vmem:[%s1983_s22 + $0x50] sm:$0xff]  ;;  %v676_v57 = vmax.f32 %v652_v47, 0.0  ;;  %v740_v3 = vld [vmem:[%s1983_s22 + $0x60] sm:$0xff] }
 0x101   : > { %v2108_v2 = vmul.f32 %v1461_v13, %v743_v9  ;;  %v1463_v30 = vpop.eup %1462  ;;  %v654_v0 = vsub.f32 %v606_v48, %v630_v34 }
 0x102   : > { %1472 = vrsqrt.f32 %v701_v44  ;;  %v679_v50 = vmax.f32 %v655_v19, 0.0  ;;  %v2120_v63 = vmul.f32 %v1463_v30, %v738_v56  ;;  %v700_v9 = vadd.f32 1e-05, %v676_v57  ;;  %v742_v44 = vld [vmem:[%s1983_s22 + $0x70] sm:$0xff]  ;;  %v744_v30 = vld [vmem:[%s1983_s22 + $0x80] sm:$0xff] }
 0x103   : > { %925 = vperm.xlu0 %1434, %v2108_v2   ;;  %1474 = vrsqrt.f32 %v696_v23  ;;  %v678_v20 = vmax.f32 %v654_v0, 0.0  ;;  %v749_v23 = vld [vmem:[%s1983_s22 + $0xa8] sm:$0xff]  ;;  %v746_v0 = vld [vmem:[%s1983_s22 + $0x90] sm:$0xff] }
 0x104   : > { %v1465_v29 = vpop.eup %1464  ;;  %v703_v51 = vadd.f32 1e-05, %v679_v50  ;;  %890 = vperm.xlu1 %1435, %v2110_v36  }
 0x105   : > { %v2118_v62 = vmul.f32 %v1465_v29, %v745_v49  ;;  %v1467_v46 = vpop.eup %1466  ;;  %v702_v43 = vadd.f32 1e-05, %v678_v20  ;;  %v751_v49 = vld [vmem:[%s1983_s22 + $0xb8] sm:$0xff]  ;;  %v801_v29 = vmul.f32 %v2000_v24, %v1943_v45  ;;  %v748_v24 = vld [vmem:[%s1983_s22 + $0xa0] sm:$0xff]  ;;  %v805_v20 = vmul.f32 %v2066_v12, %v1957_v60 }
 0x106   : > { %1476 = vrsqrt.f32 %v703_v51  ;;  %v2128_v13 = vmul.f32 %v1467_v46, %v740_v3  ;;  %v803_v46 = vmul.f32 %v2036_v18, %v1949_v52  ;;  %v750_v52 = vld [vmem:[%s1983_s22 + $0xb0] sm:$0xff]  ;;  %v800_v60 = vmul.f32 %v2004_v32, %v1947_v1  ;;  %v752_v12 = vld [vmem:[%s2146_s25] sm:$0xff] }
 0x107   : > { %935 = vperm.xlu0 %1434, %v2118_v62   ;;  %1478 = vrsqrt.f32 %v698_v5  ;;  %v753_v5 = vld [vmem:[%s2146_s25 + $0x8] sm:$0xff]  ;;  %v811_v32 = vmul.f32 %v2080_v41, %v1990_v58  ;;  %v806_v58 = vmul.f32 %v2082_v26, %v1969_v40  ;;  %v758_v41 = vld [vmem:[%s2146_s25 + $0x30] sm:$0xff]  ;;  %v817_v40 = vmul.f32 %v2118_v62, %v2033_v55  ;;  %v764_v62 = vld [vmem:[%s2146_s25 + $0x60] sm:$0xff] }
 0x108   : > { %v1469_v16 = vpop.eup %1468  ;;  %900 = vperm.xlu1 %1435, %v2120_v63   ;;  %1480 = vrsqrt.f32 %v700_v9  ;;  %v812_v55 = vmul.f32 %v2128_v13, %v2024_v4 }
 0x109   : > { %v2126_v42 = vmul.f32 %v1469_v16, %v747_v6  ;;  %v1471_v38 = vpop.eup %1470  ;;  %1482 = vrsqrt.f32 %v702_v43  ;;  %v825_v6 = vsub.f32 %v753_v5, %v801_v29  ;;  %v755_v16 = vld [vmem:[%s2146_s25 + $0x18] sm:$0xff]  ;;  %v761_v29 = vld [vmem:[%s2146_s25 + $0x48] sm:$0xff] }
 0x10a   : > { %v2136_v50 = vmul.f32 %v1471_v38, %v742_v44  ;;  %v827_v9 = vsub.f32 %v755_v16, %v803_v46  ;;  %v767_v16 = vld [vmem:[%s2146_s25 + $0x78] sm:$0xff] }
 0x10b   : > { %945 = vperm.xlu0 %1434, %v2126_v42  }
 0x10c   : > { %v1473_v19 = vpop.eup %1472  ;;  %910 = vperm.xlu1 %1435, %v2128_v13  }
 0x10d   : > { %v2134_v47 = vmul.f32 %v1473_v19, %v749_v23  ;;  %v1475_v48 = vpop.eup %1474  ;;  %v757_v23 = vld [vmem:[%s2146_s25 + $0x28] sm:$0xff]  ;;  %v807_v19 = vmul.f32 %v2097_v37, %v1972_v11  ;;  %v802_v11 = vmul.f32 %v2019_v31, %v1953_v53  ;;  %v754_v37 = vld [vmem:[%s2146_s25 + $0x10] sm:$0xff]  ;;  %v813_v53 = vmul.f32 %v2095_v8, %v1998_v15  ;;  %v760_v8 = vld [vmem:[%s2146_s25 + $0x40] sm:$0xff] }
 0x10e   : > { %v2153_v51 = vmul.f32 %v1475_v48, %v744_v30  ;;  %v829_v18 = vsub.f32 %v757_v23, %v805_v20  ;;  %v759_v48 = vld [vmem:[%s2146_s25 + $0x38] sm:$0xff]  ;;  %v809_v30 = vmul.f32 %v2064_v10, %v1974_v28  ;;  %v804_v28 = vmul.f32 %v2052_v21, %v1961_v59  ;;  %v756_v10 = vld [vmem:[%s2146_s25 + $0x20] sm:$0xff] }
 0x10f   : > { %955 = vperm.xlu0 %1434, %v2134_v47   ;;  %v826_v5 = vsub.f32 %v754_v37, %v802_v11  ;;  %v815_v59 = vmul.f32 %v2108_v2, %v2012_v33  ;;  %v830_v21 = vsub.f32 %v758_v41, %v806_v58  ;;  %v808_v15 = vmul.f32 %v2110_v36, %v1994_v14  ;;  %v762_v2 = vld [vmem:[%s2146_s25 + $0x50] sm:$0xff]  ;;  %v771_v20 = vld [vmem:[%s2146_s25 + $0x98] sm:$0xff] }
 0x110   : > { %v1477_v34 = vpop.eup %1476  ;;  %920 = vperm.xlu1 %1435, %v2136_v50   ;;  %v833_v1 = vsub.f32 %v761_v29, %v809_v30  ;;  %v828_v31 = vsub.f32 %v756_v10, %v804_v28  ;;  %v810_v33 = vmul.f32 %v2120_v63, %v2009_v22  ;;  %v819_v14 = vmul.f32 %v2126_v42, %v2046_v35  ;;  %v766_v35 = vld [vmem:[%s2146_s25 + $0x70] sm:$0xff] }
 0x111   : > { %v2149_v56 = vmul.f32 %v1477_v34, %v751_v49  ;;  %v1479_v57 = vpop.eup %1478  ;;  %v831_v49 = vsub.f32 %v759_v48, %v807_v19  ;;  %v824_v34 = vsub.f32 %v752_v12, %v800_v60  ;;  %v832_v26 = vsub.f32 %v760_v8, %v808_v15  ;;  %v770_v48 = vld [vmem:[%s2146_s25 + $0x90] sm:$0xff]  ;;  %v772_v60 = vld [vmem:[%s2146_s25 + $0xa0] sm:$0xff] }
 0x112   : > { %v2161_v3 = vmul.f32 %v1479_v57, %v746_v0  ;;  %v1481_v45 = vpop.eup %1480  ;;  %v763_v57 = vld [vmem:[%s2146_s25 + $0x58] sm:$0xff]  ;;  %v834_v36 = vsub.f32 %v762_v2, %v810_v33  ;;  %v843_v23 = vsub.f32 %v771_v20, %v819_v14  ;;  %v821_v22 = vmul.f32 %v2134_v47, %v2060_v25  ;;  %v768_v25 = vld [vmem:[%s2146_s25 + $0x80] sm:$0xff]  ;;  %v774_v12 = vld [vmem:[%s2146_s25 + $0xb0] sm:$0xff] }
 0x113   : > { %965 = vperm.xlu0 %1434, %v2149_v56   ;;  %v2168_v38 = vmul.f32 %v1481_v45, %v748_v24  ;;  %v1483_v44 = vpop.eup %1482  ;;  %v835_v0 = vsub.f32 %v763_v57, %v811_v32  ;;  %v839_v45 = vsub.f32 %v767_v16, %v815_v59  ;;  %v769_v24 = vld [vmem:[%s2146_s25 + $0x88] sm:$0xff]  ;;  %v836_v63 = vsub.f32 %v764_v62, %v812_v55  ;;  %v1484_v58 = vld [vmem:[%s1577_s18 + $0x10] sm:$0xff] }
 0x114   : > { %930 = vperm.xlu1 %1435, %v2153_v51   ;;  %v2175_v43 = vmul.f32 %v1483_v44, %v750_v52  ;;  %v773_v44 = vld [vmem:[%s2146_s25 + $0xa8] sm:$0xff]  ;;  %v814_v52 = vmul.f32 %v2136_v50, %v2029_v54  ;;  %v823_v4 = vmul.f32 %v2149_v56, %v2075_v61  ;;  %v816_v19 = vmul.f32 %v2153_v51, %v2043_v7 }
 0x115   : > { %v845_v42 = vsub.f32 %v773_v44, %v821_v22  ;;  %v818_v50 = vmul.f32 %v2161_v3, %v2070_v17  ;;  %v820_v61 = vmul.f32 %v2168_v38, %v2088_v39 }
 0x116   : > { %v838_v13 = vsub.f32 %v766_v35, %v814_v52  ;;  %v840_v54 = vsub.f32 %v768_v25, %v816_v19  ;;  %v822_v7 = vmul.f32 %v2175_v43, %v2103_v27 }
 0x117   : > { %1023 = vperm.xlu0 %1434, %v825_v6   ;;  %v765_v6 = vld [vmem:[%s2146_s25 + $0x68] sm:$0xff]  ;;  %v842_v56 = vsub.f32 %v770_v48, %v818_v50  ;;  %v844_v51 = vsub.f32 %v772_v60, %v820_v61  ;;  %v1491_v50 = vld [vmem:[%s1577_s18 + $0x78] sm:$0xff]  ;;  %v1492_v60 = vld [vmem:[%s1577_s18] sm:$0xff] }
 0x118   : > { %940 = vperm.xlu1 %1435, %v2161_v3   ;;  %v837_v46 = vsub.f32 %v765_v6, %v813_v53 }
 0x11b   : > { %1033 = vperm.xlu0 %1434, %v827_v9   ;;  %v841_v9 = vsub.f32 %v769_v24, %v817_v40 }
 0x11c   : > { %950 = vperm.xlu1 %1435, %v2168_v38  }
 0x11f   : > { %1043 = vperm.xlu0 %1434, %v829_v18   ;;  %v775_v18 = vld [vmem:[%s2146_s25 + $0xb8] sm:$0xff] }
 0x120   : > { %960 = vperm.xlu1 %1435, %v2175_v43   ;;  %v847_v47 = vsub.f32 %v775_v18, %v823_v4 }
 0x123   : > { %1053 = vperm.xlu0 %1434, %v831_v49   ;;  %v846_v49 = vsub.f32 %v774_v12, %v822_v7 }
 0x124   : > { %1018 = vperm.xlu1 %1435, %v824_v34  }
 0x127   : > { %1063 = vperm.xlu0 %1434, %v833_v1  }
 0x128   : > { %1028 = vperm.xlu1 %1435, %v826_v5  }
 0x12b   : > { %1073 = vperm.xlu0 %1434, %v835_v0  }
 0x12c   : > { %1038 = vperm.xlu1 %1435, %v828_v31  }
 0x12f   : > { %1083 = vperm.xlu0 %1434, %v837_v46   ;;  %v1485_v46 = vld [vmem:[%s1577_s18 + $0x18] sm:$0xff] }
 0x130   : > { %1048 = vperm.xlu1 %1435, %v830_v21  }
 0x133   : > { %1093 = vperm.xlu0 %1434, %v839_v45   ;;  %v1486_v45 = vld [vmem:[%s1577_s18 + $0x30] sm:$0xff] }
 0x134   : > { %1058 = vperm.xlu1 %1435, %v832_v26   ;;  %v1487_v26 = vld [vmem:[%s1577_s18 + $0x38] sm:$0xff] }
 0x137   : > { %1103 = vperm.xlu0 %1434, %v841_v9  }
 0x138   : > { %1068 = vperm.xlu1 %1435, %v834_v36  }
 0x13b   : > { %1113 = vperm.xlu0 %1434, %v843_v23   ;;  %v1488_v23 = vld [vmem:[%s1577_s18 + $0x50] sm:$0xff] }
 0x13c   : > { %1078 = vperm.xlu1 %1435, %v836_v63   ;;  %v1489_v63 = vld [vmem:[%s1577_s18 + $0x58] sm:$0xff] }
 0x13f   : > { %1123 = vperm.xlu0 %1434, %v845_v42  }
 0x140   : > { %1088 = vperm.xlu1 %1435, %v838_v13  }
 0x143   : > { %1133 = vperm.xlu0 %1434, %v847_v47   ;;  %v1490_v47 = vld [vmem:[%s1577_s18 + $0x70] sm:$0xff] }
 0x144   : > { %1098 = vperm.xlu1 %1435, %v840_v54  }
 0x148   : > { %1108 = vperm.xlu1 %1435, %v842_v56  }
 0x14c   : > { %1118 = vperm.xlu1 %1435, %v844_v51   ;;  %v1493_v51 = vld [vmem:[%s1577_s18 + $0x8] sm:$0xff] }
 0x150   : > { %1128 = vperm.xlu1 %1435, %v846_v49  }
 0x166   : > { %v856_v30 = vpop.permute.xlu1 %855 }
 0x167   : > { %v2241_v3 = vpop.permute.xlu0 %850  ;;  %v970_v41 = vmul.f32 %v1484_v58, %v856_v30  ;;  %v971_v59 = vmul.f32 %v1485_v46, %v856_v30 }
 0x168   : > { %v968_v7 = vmul.f32 %v1492_v60, %v2241_v3  ;;  %v969_v12 = vmul.f32 %v1493_v51, %v2241_v3 }
 0x16b   : > { %v2239_v34 = vpop.permute.xlu1 %860 }
 0x16f   : > { %v866_v17 = vpop.permute.xlu1 %865 }
 0x170   : > { %v974_v40 = vmul.f32 %v1486_v45, %v866_v17  ;;  %v975_v24 = vmul.f32 %v1487_v26, %v866_v17 }
 0x173   : > { %v2243_v29 = vpop.permute.xlu1 %870 }
 0x176   : > { %v2245_v39 = vpop.permute.xlu0 %895 }
 0x177   : > { %v876_v38 = vpop.permute.xlu1 %875 }
 0x178   : > { %v978_v22 = vmul.f32 %v1488_v23, %v876_v38  ;;  %v979_v44 = vmul.f32 %v1489_v63, %v876_v38 }
 0x17a   : > { %v2247_v11 = vpop.permute.xlu0 %905 }
 0x17b   : > { %v2249_v27 = vpop.permute.xlu1 %880 }
 0x17e   : > { %v2251_v43 = vpop.permute.xlu0 %915 }
 0x17f   : > { %v886_v37 = vpop.permute.xlu1 %885 }
 0x180   : > { %v982_v54 = vmul.f32 %v1490_v47, %v886_v37  ;;  %v983_v48 = vmul.f32 %v1491_v50, %v886_v37 }
 0x182   : > { %v2253_v1 = vpop.permute.xlu0 %925 }
 0x183   : > { %v2255_v32 = vpop.permute.xlu1 %890 }
 0x186   : > { %v2257_v5 = vpop.permute.xlu0 %935 }
 0x187   : > { %v2259_v57 = vpop.permute.xlu1 %900 }
 0x18a   : > { %v2261_v28 = vpop.permute.xlu0 %945 }
 0x18b   : > { %v2263_v10 = vpop.permute.xlu1 %910 }
 0x18e   : > { %v2265_v0 = vpop.permute.xlu0 %955 }
 0x18f   : > { %v2267_v53 = vpop.permute.xlu1 %920 }
 0x192   : > { %v2269_v31 = vpop.permute.xlu0 %965 }
 0x193   : > { %v2271_v6 = vpop.permute.xlu1 %930 }
 0x196   : > { %v1024_v21 = vpop.permute.xlu0 %1023 }
 0x197   : > { %v2275_v16 = vpop.permute.xlu1 %940  ;;  %v1138_v15 = vadd.f32 %v1024_v21, %v970_v41  ;;  %v1139_v8 = vadd.f32 %v1024_v21, %v971_v59  ;;  %v1494_v59 = vld [vmem:[%s1577_s18 + $0x90] sm:$0xff] }
 0x198   : > { %v986_v21 = vmul.f32 %v1494_v59, %v2245_v39 }
 0x199   : > { %v1186_v33 = vmax.f32 %v1138_v15, 0.0  ;;  %v1187_v2 = vmax.f32 %v1139_v8, 0.0  ;;  %v1495_v15 = vld [vmem:[%s1577_s18 + $0x98] sm:$0xff] }
 0x19a   : > { %v1034_v9 = vpop.permute.xlu0 %1033  ;;  %v987_v8 = vmul.f32 %v1495_v15, %v2245_v39 }
 0x19b   : > { %v1234_v14 = vmin.f32 %v1186_v33, 6.0  ;;  %v1235_v36 = vmin.f32 %v1187_v2, 6.0  ;;  %v2286_v20 = vpop.permute.xlu1 %950  ;;  %v1142_v55 = vadd.f32 %v1034_v9, %v974_v40  ;;  %v1143_v62 = vadd.f32 %v1034_v9, %v975_v24  ;;  %v1496_v40 = vld [vmem:[%s1577_s18 + $0x20] sm:$0xff]  ;;  %v1497_v24 = vld [vmem:[%s1577_s18 + $0x28] sm:$0xff] }
 0x19c   : > { %v972_v26 = vmul.f32 %v1496_v40, %v2239_v34  ;;  %v973_v33 = vmul.f32 %v1497_v24, %v2239_v34 }
 0x19d   : > { %1282 = vst [vmem:[%s2284_s28 + $0x10] sm:$0xff] %v1234_v14  ;;  %1283 = vst.msk [vmem:[%s2284_s28 + $0x18] sm:$0xff] %vm271_vm0, %v1235_v36  ;;  %v1190_v52 = vmax.f32 %v1142_v55, 0.0  ;;  %v1191_v35 = vmax.f32 %v1143_v62, 0.0 }
 0x19e   : > { %v1044_v42 = vpop.permute.xlu0 %1043 }
 0x19f   : > { %v1238_v4 = vmin.f32 %v1190_v52, 6.0  ;;  %v1239_v13 = vmin.f32 %v1191_v35, 6.0  ;;  %v2293_v18 = vpop.permute.xlu1 %960  ;;  %v1146_v19 = vadd.f32 %v1044_v42, %v978_v22  ;;  %v1147_v25 = vadd.f32 %v1044_v42, %v979_v44  ;;  %v1498_v35 = vld [vmem:[%s1577_s18 + $0xb0] sm:$0xff]  ;;  %v1499_v42 = vld [vmem:[%s1577_s18 + $0xb8] sm:$0xff] }
 0x1a0   : > { %v990_v34 = vmul.f32 %v1498_v35, %v2247_v11 }
 0x1a1   : > { %1286 = vst [vmem:[%s2284_s28 + $0x30] sm:$0xff] %v1238_v4  ;;  %1287 = vst.msk [vmem:[%s2284_s28 + $0x38] sm:$0xff] %vm271_vm0, %v1239_v13  ;;  %v1194_v61 = vmax.f32 %v1146_v19, 0.0  ;;  %v1195_v56 = vmax.f32 %v1147_v25, 0.0  ;;  %v991_v4 = vmul.f32 %v1499_v42, %v2247_v11  ;;  %v1500_v25 = vld [vmem:[%s1577_s18 + $0x40] sm:$0xff] }
 0x1a2   : > { %v1054_v49 = vpop.permute.xlu0 %1053  ;;  %v976_v47 = vmul.f32 %v1500_v25, %v2243_v29 }
 0x1a3   : > { %v1242_v30 = vmin.f32 %v1194_v61, 6.0  ;;  %v1243_v17 = vmin.f32 %v1195_v56, 6.0  ;;  %v1019_v38 = vpop.permute.xlu1 %1018  ;;  %v1150_v37 = vadd.f32 %v1054_v49, %v982_v54  ;;  %v1151_v58 = vadd.f32 %v1054_v49, %v983_v48  ;;  %v1501_v54 = vld [vmem:[%s1577_s18 + $0x48] sm:$0xff] }
 0x1a4   : > { %v1136_v41 = vadd.f32 %v1019_v38, %v968_v7  ;;  %v1137_v46 = vadd.f32 %v1019_v38, %v969_v12  ;;  %v977_v50 = vmul.f32 %v1501_v54, %v2243_v29  ;;  %v1502_v38 = vld [vmem:[%s1577_s18 + $0xd0] sm:$0xff] }
 0x1a5   : > { %1290 = vst [vmem:[%s2284_s28 + $0x50] sm:$0xff] %v1242_v30  ;;  %1291 = vst.msk [vmem:[%s2284_s28 + $0x58] sm:$0xff] %vm271_vm0, %v1243_v17  ;;  %v1198_v3 = vmax.f32 %v1150_v37, 0.0  ;;  %v1199_v45 = vmax.f32 %v1151_v58, 0.0  ;;  %v994_v37 = vmul.f32 %v1502_v38, %v2251_v43  ;;  %v1503_v58 = vld [vmem:[%s1577_s18 + $0xd8] sm:$0xff] }
 0x1a6   : > { %v1184_v2 = vmax.f32 %v1136_v41, 0.0  ;;  %v1185_v9 = vmax.f32 %v1137_v46, 0.0  ;;  %v1064_v14 = vpop.permute.xlu0 %1063  ;;  %v995_v41 = vmul.f32 %v1503_v58, %v2251_v43 }
 0x1a7   : > { %v1246_v36 = vmin.f32 %v1198_v3, 6.0  ;;  %v1247_v39 = vmin.f32 %v1199_v45, 6.0  ;;  %v1029_v55 = vpop.permute.xlu1 %1028  ;;  %v1154_v62 = vadd.f32 %v1064_v14, %v986_v21  ;;  %v1155_v23 = vadd.f32 %v1064_v14, %v987_v8  ;;  %v1504_v21 = vld [vmem:[%s1577_s18 + $0x60] sm:$0xff]  ;;  %v1505_v8 = vld [vmem:[%s1577_s18 + $0x68] sm:$0xff] }
 0x1a8   : > { %v1232_v22 = vmin.f32 %v1184_v2, 6.0  ;;  %v1233_v63 = vmin.f32 %v1185_v9, 6.0  ;;  %v1140_v44 = vadd.f32 %v1029_v55, %v972_v26  ;;  %v1141_v52 = vadd.f32 %v1029_v55, %v973_v33  ;;  %v1506_v55 = vld [vmem:[%s1577_s18 + $0xf0] sm:$0xff] }
 0x1a9   : > { %1294 = vst [vmem:[%s2284_s28 + $0x70] sm:$0xff] %v1246_v36  ;;  %1295 = vst.msk [vmem:[%s2284_s28 + $0x78] sm:$0xff] %vm271_vm0, %v1247_v39  ;;  %v1202_v13 = vmax.f32 %v1154_v62, 0.0  ;;  %v1203_v19 = vmax.f32 %v1155_v23, 0.0  ;;  %v980_v15 = vmul.f32 %v1504_v21, %v2249_v27  ;;  %v981_v3 = vmul.f32 %v1505_v8, %v2249_v27  ;;  %v1507_v23 = vld [vmem:[%s1577_s18 + $0xf8] sm:$0xff] }
 0x1aa   : > { %1280 = vst [vmem:[%s2284_s28] sm:$0xff] %v1232_v22  ;;  %1281 = vst.msk [vmem:[%s2284_s28 + $0x8] sm:$0xff] %vm271_vm0, %v1233_v63  ;;  %v1188_v48 = vmax.f32 %v1140_v44, 0.0  ;;  %v1189_v61 = vmax.f32 %v1141_v52, 0.0  ;;  %v1074_v11 = vpop.permute.xlu0 %1073  ;;  %v998_v62 = vmul.f32 %v1506_v55, %v2253_v1  ;;  %v999_v22 = vmul.f32 %v1507_v23, %v2253_v1  ;;  %v1508_v52 = vld [vmem:[%s1577_s18 + $0x80] sm:$0xff] }
 0x1ab   : > { %v1250_v56 = vmin.f32 %v1202_v13, 6.0  ;;  %v1251_v60 = vmin.f32 %v1203_v19, 6.0  ;;  %v1039_v7 = vpop.permute.xlu1 %1038  ;;  %v1158_v51 = vadd.f32 %v1074_v11, %v990_v34  ;;  %v1159_v12 = vadd.f32 %v1074_v11, %v991_v4  ;;  %v1509_v34 = vld [vmem:[%s1577_s18 + $0x88] sm:$0xff] }
 0x1ac   : > { %v1236_v49 = vmin.f32 %v1188_v48, 6.0  ;;  %v1237_v30 = vmin.f32 %v1189_v61, 6.0  ;;  %v1144_v29 = vadd.f32 %v1039_v7, %v976_v47  ;;  %v1145_v17 = vadd.f32 %v1039_v7, %v977_v50  ;;  %v1511_v7 = vld [vmem:[%s1577_s18 + $0x118] sm:$0xff] }
 0x1ad   : > { %1298 = vst [vmem:[%s2284_s28 + $0x90] sm:$0xff] %v1250_v56  ;;  %1299 = vst.msk [vmem:[%s2284_s28 + $0x98] sm:$0xff] %vm271_vm0, %v1251_v60  ;;  %v1206_v46 = vmax.f32 %v1158_v51, 0.0  ;;  %v1207_v59 = vmax.f32 %v1159_v12, 0.0  ;;  %v984_v35 = vmul.f32 %v1508_v52, %v2255_v32  ;;  %v985_v42 = vmul.f32 %v1509_v34, %v2255_v32  ;;  %v1510_v56 = vld [vmem:[%s1577_s18 + $0x110] sm:$0xff] }
 0x1ae   : > { %1284 = vst [vmem:[%s2284_s28 + $0x20] sm:$0xff] %v1236_v49  ;;  %1285 = vst.msk [vmem:[%s2284_s28 + $0x28] sm:$0xff] %vm271_vm0, %v1237_v30  ;;  %v1192_v45 = vmax.f32 %v1144_v29, 0.0  ;;  %v1193_v40 = vmax.f32 %v1145_v17, 0.0  ;;  %v1084_v43 = vpop.permute.xlu0 %1083  ;;  %v1002_v60 = vmul.f32 %v1510_v56, %v2257_v5  ;;  %v1003_v51 = vmul.f32 %v1511_v7, %v2257_v5  ;;  %v1512_v30 = vld [vmem:[%s1577_s18 + $0xa0] sm:$0xff]  ;;  %v1513_v17 = vld [vmem:[%s1577_s18 + $0xa8] sm:$0xff] }
 0x1af   : > { %v1254_v26 = vmin.f32 %v1206_v46, 6.0  ;;  %v1255_v24 = vmin.f32 %v1207_v59, 6.0  ;;  %v1049_v33 = vpop.permute.xlu1 %1048  ;;  %v1162_v2 = vadd.f32 %v1084_v43, %v994_v37  ;;  %v1163_v9 = vadd.f32 %v1084_v43, %v995_v41 }
 0x1b0   : > { %v1240_v14 = vmin.f32 %v1192_v45, 6.0  ;;  %v1241_v36 = vmin.f32 %v1193_v40, 6.0  ;;  %v1148_v27 = vadd.f32 %v1049_v33, %v980_v15  ;;  %v1149_v39 = vadd.f32 %v1049_v33, %v981_v3  ;;  %v1514_v40 = vld [vmem:[%s1577_s18 + $0x130] sm:$0xff] }
 0x1b1   : > { %1302 = vst [vmem:[%s2284_s28 + $0xb0] sm:$0xff] %v1254_v26  ;;  %1303 = vst.msk [vmem:[%s2284_s28 + $0xb8] sm:$0xff] %vm271_vm0, %v1255_v24  ;;  %v1210_v63 = vmax.f32 %v1162_v2, 0.0  ;;  %v1211_v44 = vmax.f32 %v1163_v9, 0.0  ;;  %v988_v29 = vmul.f32 %v1512_v30, %v2259_v57  ;;  %v989_v38 = vmul.f32 %v1513_v17, %v2259_v57  ;;  %v1515_v26 = vld [vmem:[%s1577_s18 + $0x138] sm:$0xff]  ;;  %v1516_v9 = vld [vmem:[%s1577_s18 + $0xc0] sm:$0xff] }
 0x1b2   : > { %1288 = vst [vmem:[%s2284_s28 + $0x40] sm:$0xff] %v1240_v14  ;;  %1289 = vst.msk [vmem:[%s2284_s28 + $0x48] sm:$0xff] %vm271_vm0, %v1241_v36  ;;  %v1196_v4 = vmax.f32 %v1148_v27, 0.0  ;;  %v1197_v13 = vmax.f32 %v1149_v39, 0.0  ;;  %v1094_v1 = vpop.permute.xlu0 %1093  ;;  %v1006_v43 = vmul.f32 %v1514_v40, %v2261_v28  ;;  %v1007_v24 = vmul.f32 %v1515_v26, %v2261_v28  ;;  %v1517_v36 = vld [vmem:[%s1577_s18 + $0xc8] sm:$0xff] }
 0x1b3   : > { %v1258_v19 = vmin.f32 %v1210_v63, 6.0  ;;  %v1259_v25 = vmin.f32 %v1211_v44, 6.0  ;;  %v1059_v47 = vpop.permute.xlu1 %1058  ;;  %v1166_v54 = vadd.f32 %v1094_v1, %v998_v62  ;;  %v1167_v50 = vadd.f32 %v1094_v1, %v999_v22 }
 0x1b4   : > { %v1244_v48 = vmin.f32 %v1196_v4, 6.0  ;;  %v1245_v61 = vmin.f32 %v1197_v13, 6.0  ;;  %v1152_v32 = vadd.f32 %v1059_v47, %v984_v35  ;;  %v1153_v11 = vadd.f32 %v1059_v47, %v985_v42  ;;  %v1518_v42 = vld [vmem:[%s1577_s18 + $0x150] sm:$0xff]  ;;  %v1519_v13 = vld [vmem:[%s1577_s18 + $0x158] sm:$0xff]  ;;  %v1520_v47 = vld [vmem:[%s1577_s18 + $0xe0] sm:$0xff] }
 0x1b5   : > { %1306 = vst [vmem:[%s2284_s28 + $0xd0] sm:$0xff] %v1258_v19  ;;  %1307 = vst.msk [vmem:[%s2284_s28 + $0xd8] sm:$0xff] %vm271_vm0, %v1259_v25  ;;  %v1214_v12 = vmax.f32 %v1166_v54, 0.0  ;;  %v1215_v49 = vmax.f32 %v1167_v50, 0.0  ;;  %v992_v14 = vmul.f32 %v1516_v9, %v2263_v10  ;;  %v993_v27 = vmul.f32 %v1517_v36, %v2263_v10  ;;  %v1521_v50 = vld [vmem:[%s1577_s18 + $0xe8] sm:$0xff] }
 0x1b6   : > { %1292 = vst [vmem:[%s2284_s28 + $0x60] sm:$0xff] %v1244_v48  ;;  %1293 = vst.msk [vmem:[%s2284_s28 + $0x68] sm:$0xff] %vm271_vm0, %v1245_v61  ;;  %v1200_v37 = vmax.f32 %v1152_v32, 0.0  ;;  %v1201_v58 = vmax.f32 %v1153_v11, 0.0  ;;  %v1104_v5 = vpop.permute.xlu0 %1103  ;;  %v1010_v4 = vmul.f32 %v1518_v42, %v2265_v0  ;;  %v1011_v1 = vmul.f32 %v1519_v13, %v2265_v0 }
 0x1b7   : > { %v1262_v41 = vmin.f32 %v1214_v12, 6.0  ;;  %v1263_v46 = vmin.f32 %v1215_v49, 6.0  ;;  %v1069_v59 = vpop.permute.xlu1 %1068  ;;  %v1170_v21 = vadd.f32 %v1104_v5, %v1002_v60  ;;  %v1171_v15 = vadd.f32 %v1104_v5, %v1003_v51 }
 0x1b8   : > { %v1248_v8 = vmin.f32 %v1200_v37, 6.0  ;;  %v1249_v3 = vmin.f32 %v1201_v58, 6.0  ;;  %v1156_v57 = vadd.f32 %v1069_v59, %v988_v29  ;;  %v1157_v45 = vadd.f32 %v1069_v59, %v989_v38  ;;  %v1522_v29 = vld [vmem:[%s1577_s18 + $0x170] sm:$0xff]  ;;  %v1523_v38 = vld [vmem:[%s1577_s18 + $0x178] sm:$0xff]  ;;  %v1525_v59 = vld [vmem:[%s1577_s18 + $0x108] sm:$0xff] }
 0x1b9   : > { %1310 = vst [vmem:[%s2284_s28 + $0xf0] sm:$0xff] %v1262_v41  ;;  %1311 = vst.msk [vmem:[%s2284_s28 + $0xf8] sm:$0xff] %vm271_vm0, %v1263_v46  ;;  %v1218_v33 = vmax.f32 %v1170_v21, 0.0  ;;  %v1219_v2 = vmax.f32 %v1171_v15, 0.0  ;;  %v996_v54 = vmul.f32 %v1520_v47, %v2267_v53  ;;  %v997_v48 = vmul.f32 %v1521_v50, %v2267_v53  ;;  %v1524_v41 = vld [vmem:[%s1577_s18 + $0x100] sm:$0xff] }
 0x1ba   : > { %1296 = vst [vmem:[%s2284_s28 + $0x80] sm:$0xff] %v1248_v8  ;;  %1297 = vst.msk [vmem:[%s2284_s28 + $0x88] sm:$0xff] %vm271_vm0, %v1249_v3  ;;  %v1204_v39 = vmax.f32 %v1156_v57, 0.0  ;;  %v1205_v55 = vmax.f32 %v1157_v45, 0.0  ;;  %v1114_v28 = vpop.permute.xlu0 %1113  ;;  %v1014_v17 = vmul.f32 %v1522_v29, %v2269_v31  ;;  %v1015_v37 = vmul.f32 %v1523_v38, %v2269_v31  ;;  %v1530_v50 = vld [vmem:[%s1577_s18 + $0x160] sm:$0xff] }
 0x1bb   : > { %v1266_v62 = vmin.f32 %v1218_v33, 6.0  ;;  %v1267_v23 = vmin.f32 %v1219_v2, 6.0  ;;  %v1079_v22 = vpop.permute.xlu1 %1078  ;;  %v1174_v63 = vadd.f32 %v1114_v28, %v1006_v43  ;;  %v1175_v44 = vadd.f32 %v1114_v28, %v1007_v24 }
 0x1bc   : > { %v1252_v52 = vmin.f32 %v1204_v39, 6.0  ;;  %v1253_v35 = vmin.f32 %v1205_v55, 6.0  ;;  %v1160_v10 = vadd.f32 %v1079_v22, %v992_v14  ;;  %v1161_v34 = vadd.f32 %v1079_v22, %v993_v27  ;;  %v1526_v14 = vld [vmem:[%s1577_s18 + $0x120] sm:$0xff]  ;;  %v1527_v27 = vld [vmem:[%s1577_s18 + $0x128] sm:$0xff] }
 0x1bd   : > { %1314 = vst [vmem:[%s2284_s28 + $0x110] sm:$0xff] %v1266_v62  ;;  %1315 = vst.msk [vmem:[%s2284_s28 + $0x118] sm:$0xff] %vm271_vm0, %v1267_v23  ;;  %v1222_v19 = vmax.f32 %v1174_v63, 0.0  ;;  %v1223_v25 = vmax.f32 %v1175_v44, 0.0  ;;  %v1000_v46 = vmul.f32 %v1524_v41, %v2271_v6  ;;  %v1001_v21 = vmul.f32 %v1525_v59, %v2271_v6 }
 0x1be   : > { %1300 = vst [vmem:[%s2284_s28 + $0xa0] sm:$0xff] %v1252_v52  ;;  %1301 = vst.msk [vmem:[%s2284_s28 + $0xa8] sm:$0xff] %vm271_vm0, %v1253_v35  ;;  %v1208_v61 = vmax.f32 %v1160_v10, 0.0  ;;  %v1209_v32 = vmax.f32 %v1161_v34, 0.0  ;;  %v1124_v0 = vpop.permute.xlu0 %1123  ;;  %v1004_v36 = vmul.f32 %v1526_v14, %v2275_v16  ;;  %v1005_v39 = vmul.f32 %v1527_v27, %v2275_v16  ;;  %v1528_v16 = vld [vmem:[%s1577_s18 + $0x140] sm:$0xff]  ;;  %v1529_v34 = vld [vmem:[%s1577_s18 + $0x148] sm:$0xff] }
 0x1bf   : > { %v1270_v11 = vmin.f32 %v1222_v19, 6.0  ;;  %v1271_v56 = vmin.f32 %v1223_v25, 6.0  ;;  %v1089_v60 = vpop.permute.xlu1 %1088  ;;  %v1178_v7 = vadd.f32 %v1124_v0, %v1010_v4  ;;  %v1179_v51 = vadd.f32 %v1124_v0, %v1011_v1 }
 0x1c0   : > { %v1256_v12 = vmin.f32 %v1208_v61, 6.0  ;;  %v1257_v49 = vmin.f32 %v1209_v32, 6.0  ;;  %v1164_v53 = vadd.f32 %v1089_v60, %v996_v54  ;;  %v1165_v30 = vadd.f32 %v1089_v60, %v997_v48  ;;  %v1531_v61 = vld [vmem:[%s1577_s18 + $0x168] sm:$0xff] }
 0x1c1   : > { %1318 = vst [vmem:[%s2284_s28 + $0x130] sm:$0xff] %v1270_v11  ;;  %1319 = vst.msk [vmem:[%s2284_s28 + $0x138] sm:$0xff] %vm271_vm0, %v1271_v56  ;;  %v1226_v58 = vmax.f32 %v1178_v7, 0.0  ;;  %v1227_v5 = vmax.f32 %v1179_v51, 0.0  ;;  %v1008_v10 = vmul.f32 %v1528_v16, %v2286_v20  ;;  %v1009_v42 = vmul.f32 %v1529_v34, %v2286_v20 }
 0x1c2   : > { %1304 = vst [vmem:[%s2284_s28 + $0xc0] sm:$0xff] %v1256_v12  ;;  %1305 = vst.msk [vmem:[%s2284_s28 + $0xc8] sm:$0xff] %vm271_vm0, %v1257_v49  ;;  %v1212_v15 = vmax.f32 %v1164_v53, 0.0  ;;  %v1213_v8 = vmax.f32 %v1165_v30, 0.0  ;;  %v1134_v31 = vpop.permute.xlu0 %1133  ;;  %v1012_v48 = vmul.f32 %v1530_v50, %v2293_v18  ;;  %v1013_v32 = vmul.f32 %v1531_v61, %v2293_v18 }
 0x1c3   : > { %v1274_v3 = vmin.f32 %v1226_v58, 6.0  ;;  %v1275_v57 = vmin.f32 %v1227_v5, 6.0  ;;  %v1099_v45 = vpop.permute.xlu1 %1098  ;;  %v1182_v40 = vadd.f32 %v1134_v31, %v1014_v17  ;;  %v1183_v43 = vadd.f32 %v1134_v31, %v1015_v37 }
 0x1c4   : > { %v1260_v26 = vmin.f32 %v1212_v15, 6.0  ;;  %v1261_v24 = vmin.f32 %v1213_v8, 6.0  ;;  %v1168_v33 = vadd.f32 %v1099_v45, %v1000_v46  ;;  %v1169_v6 = vadd.f32 %v1099_v45, %v1001_v21 }
 0x1c5   : > { %1322 = vst [vmem:[%s2284_s28 + $0x150] sm:$0xff] %v1274_v3  ;;  %1323 = vst.msk [vmem:[%s2284_s28 + $0x158] sm:$0xff] %vm271_vm0, %v1275_v57  ;;  %v1230_v2 = vmax.f32 %v1182_v40, 0.0  ;;  %v1231_v9 = vmax.f32 %v1183_v43, 0.0 }
 0x1c6   : > { %1308 = vst [vmem:[%s2284_s28 + $0xe0] sm:$0xff] %v1260_v26  ;;  %1309 = vst.msk [vmem:[%s2284_s28 + $0xe8] sm:$0xff] %vm271_vm0, %v1261_v24  ;;  %v1216_v55 = vmax.f32 %v1168_v33, 0.0  ;;  %v1217_v28 = vmax.f32 %v1169_v6, 0.0 }
 0x1c7   : > { %v1278_v62 = vmin.f32 %v1230_v2, 6.0  ;;  %v1279_v23 = vmin.f32 %v1231_v9, 6.0  ;;  %v1109_v22 = vpop.permute.xlu1 %1108 }
 0x1c8   : > { %v1264_v63 = vmin.f32 %v1216_v55, 6.0  ;;  %v1265_v44 = vmin.f32 %v1217_v28, 6.0  ;;  %v1172_v52 = vadd.f32 %v1109_v22, %v1004_v36  ;;  %v1173_v35 = vadd.f32 %v1109_v22, %v1005_v39 }
 0x1c9   : > { %1326 = vst [vmem:[%s2284_s28 + $0x170] sm:$0xff] %v1278_v62  ;;  %1327 = vst.msk [vmem:[%s2284_s28 + $0x178] sm:$0xff] %vm271_vm0, %v1279_v23 }
 0x1ca   : > { %1312 = vst [vmem:[%s2284_s28 + $0x100] sm:$0xff] %v1264_v63  ;;  %1313 = vst.msk [vmem:[%s2284_s28 + $0x108] sm:$0xff] %vm271_vm0, %v1265_v44  ;;  %v1220_v4 = vmax.f32 %v1172_v52, 0.0  ;;  %v1221_v13 = vmax.f32 %v1173_v35, 0.0 }
 0x1cb   : > { %v1119_v1 = vpop.permute.xlu1 %1118 }
 0x1cc   : > { %v1268_v19 = vmin.f32 %v1220_v4, 6.0  ;;  %v1269_v25 = vmin.f32 %v1221_v13, 6.0  ;;  %v1176_v47 = vadd.f32 %v1119_v1, %v1008_v10  ;;  %v1177_v54 = vadd.f32 %v1119_v1, %v1009_v42 }
 0x1ce   : > { %1316 = vst [vmem:[%s2284_s28 + $0x120] sm:$0xff] %v1268_v19  ;;  %1317 = vst.msk [vmem:[%s2284_s28 + $0x128] sm:$0xff] %vm271_vm0, %v1269_v25  ;;  %v1224_v20 = vmax.f32 %v1176_v47, 0.0  ;;  %v1225_v0 = vmax.f32 %v1177_v54, 0.0 }
 0x1cf   : > { %v1129_v11 = vpop.permute.xlu1 %1128 }
 0x1d0   : > { %v1272_v56 = vmin.f32 %v1224_v20, 6.0  ;;  %v1273_v60 = vmin.f32 %v1225_v0, 6.0  ;;  %v1180_v7 = vadd.f32 %v1129_v11, %v1012_v48  ;;  %v1181_v51 = vadd.f32 %v1129_v11, %v1013_v32 }
 0x1d2   : > { %1320 = vst [vmem:[%s2284_s28 + $0x140] sm:$0xff] %v1272_v56  ;;  %1321 = vst.msk [vmem:[%s2284_s28 + $0x148] sm:$0xff] %vm271_vm0, %v1273_v60  ;;  %v1228_v12 = vmax.f32 %v1180_v7, 0.0  ;;  %v1229_v49 = vmax.f32 %v1181_v51, 0.0 }
 0x1d4   : > { %v1276_v53 = vmin.f32 %v1228_v12, 6.0  ;;  %v1277_v30 = vmin.f32 %v1229_v49, 6.0 }
 0x1d6   : > { %1324 = vst [vmem:[%s2284_s28 + $0x160] sm:$0xff] %v1276_v53  ;;  %1325 = vst.msk [vmem:[%s2284_s28 + $0x168] sm:$0xff] %vm271_vm0, %v1277_v30 }
 0x1d7 PF: > { %s13_s12 = sadd.s32 1, %s1538_s12  }
 0x1d8   : > { %p10_p4 = scmp.ge.s32.totalorder %s13_s12, 4  }
 0x1da   :  { %12 = sbr.rel (!%p10_p4) target bundleno = 1 (0x1), region = 68 }

</bundles_post_ra>
